<compile_context>
chip_gen: v7x
topology: tpu7x:2x2x1
jax: 0.10.0
libtpu: 0.0.40
codegen_flags: <defaults>
</compile_context>

<pallas_src>
import functools

import jax
import jax.numpy as jnp
from jax import lax
from jax.experimental import pallas as pl
from jax.experimental.pallas import tpu as pltpu


# ------------------------------ fused kernel -------------------------------

def _bottleneck_csp_kernel(
        x_ref, masks_ref,
        cv1_w, cv1_s, cv1_b,
        mb1_w, mb1_s, mb1_b,
        mb2_w, mb2_s, mb2_b,
        cv3_w, cv2_w,
        bn1_s, bn1_b, bn2_s, bn2_b,
        cv4_w, cv4_s, cv4_b,
        o_ref,
        slab_ref,
        *, W, n, c_p, shortcut):
    L = x_ref.shape[1]                      # lanes per tile = nb * H * W

    def mm(w, a):                           # MXU dot, f32 accumulate
        return jnp.dot(w, a.astype(w.dtype), preferred_element_type=jnp.float32)

    def silu(v):                            # f32 epilogue (EUP sigmoid)
        return v * jax.nn.sigmoid(v)

    # 9 taps of a 'same' 3x3 conv on the flattened lane axis: static lane-roll
    # offset + zero-padding border mask (the mask also kills any roll that
    # crosses an image boundary, so folding the batch into lanes is safe).
    # Masks are host-built (8, L) and broadcast to (c_p, L) ONCE, hoisted
    # outside the n-Bottleneck loop (broadcast_in_dim is not CSE'd by JAX).
    taps = []
    mi = 0
    for kh in range(3):
        for kw in range(3):
            dh, dw = kh - 1, kw - 1
            if dh == 0 and dw == 0:
                taps.append((0, None))
            else:
                mask = jnp.broadcast_to(masks_ref[mi:mi + 1, :], (c_p, L))
                taps.append((dh * W + dw, mask))
                mi += 1

    def conv3x3_bn_silu(v, w_flat, s, b):
        # Build the (9*c_p, L) im2col slab in VMEM scratch (XLU lane rolls +
        # border masks emulate zero padding), then ONE MXU contraction over
        # all taps*channels instead of 9 skinny matmuls.  Every slab row is
        # rewritten on every call, so no zero-init of the scratch is needed.
        for t, (off, mask) in enumerate(taps):
            if mask is None:
                part = v
            else:
                part = pltpu.roll(v, (-off) % L, axis=1) * mask
            slab_ref[t * c_p:(t + 1) * c_p, :] = part.astype(slab_ref.dtype)
        y = mm(w_flat, slab_ref[...])
        return silu(y * s + b)

    x = x_ref[...]                          # (C1, L): lane-dense

    # cv1 = Conv(c1, c_, 1): 1x1 conv + folded BN + SiLU as one matmul.
    y = silu(mm(cv1_w[...], x) * cv1_s[...] + cv1_b[...])

    # self.m = n x Bottleneck(c_, c_, shortcut, e=1.0), residual add fused.
    for i in range(n):
        t = silu(mm(mb1_w[i], y) * mb1_s[i] + mb1_b[i])
        t = conv3x3_bn_silu(t, mb2_w[i], mb2_s[i], mb2_b[i])
        y = y + t if shortcut else t

    # y1 = cv3(m(cv1(x))), y2 = cv2(x): raw 1x1 convs (bias=False, no BN/act).
    y1 = mm(cv3_w[...], y)
    y2 = mm(cv2_w[...], x)

    # cat([y1, y2], ch) -> BN(2c_) -> SiLU with the concat folded away: the
    # BN halves are applied separately.
    z1 = silu(y1 * bn1_s[...] + bn1_b[...])
    z2 = silu(y2 * bn2_s[...] + bn2_b[...])

    # cv4 as a single K=2*c_p dot: stack z1/z2 into the first 2*c_p slab rows
    # (reuses scratch; one MXU weight push / one result drain instead of two).
    slab_ref[0:c_p, :] = z1.astype(slab_ref.dtype)
    slab_ref[c_p:2 * c_p, :] = z2.astype(slab_ref.dtype)
    out = mm(cv4_w[...], slab_ref[0:2 * c_p, :])
    out = silu(out * cv4_s[...] + cv4_b[...])

    o_ref[...] = out.astype(o_ref.dtype)    # lane-dense (c2_p, L) store


def bottleneck_csp_pallas(x_nchw, packed, *, shortcut=True, lane_target=512):
    """Fused BottleneckCSP forward.  x_nchw: (N, C1, H, W) like torch."""
    N, C1, H, W = x_nchw.shape
    HW = H * W
    c2 = packed["c2"]
    n = packed["mb1_w"].shape[0]
    c_p = packed["cv1_w"].shape[0]
    c2_p = packed["cv4_w"].shape[0]
    mdt = packed["cv1_w"].dtype

    # Fold the batch into the lane axis: each grid step streams nb images
    # (>= lane_target lanes when the batch allows).  Grid steps are disjoint
    # ("parallel") so they shard across TensorCores when n_tiles > 1.
    nb = max(1, min(N, -(-lane_target // HW)))
    n_tiles = -(-N // nb)
    N_pad = n_tiles * nb
    L = nb * HW

    x = x_nchw.reshape(N, C1, HW)
    if N_pad != N:
        x = jnp.concatenate([x, jnp.zeros((N_pad - N, C1, HW), x.dtype)], 0)
    # NCHW -> (C, N*H*W): one-time relayout outside the kernel (layout
    # plumbing; in a full network activations would stay in this layout).
    x = jnp.transpose(x, (1, 0, 2)).reshape(C1, N_pad * HW)

    # Border masks for the 8 non-center taps of a 'same' 3x3 conv, built on
    # the host once (no vector int-div work inside the kernel).
    sp = jnp.arange(L, dtype=jnp.int32) % HW
    rr, cc = sp // W, sp % W
    mask_rows = []
    for kh in range(3):
        for kw in range(3):
            dh, dw = kh - 1, kw - 1
            if dh == 0 and dw == 0:
                continue
            valid = ((rr + dh >= 0) & (rr + dh < H) &
                     (cc + dw >= 0) & (cc + dw < W))
            mask_rows.append(valid.astype(jnp.float32))
    masks = jnp.stack(mask_rows)                              # (8, L)

    order = ("cv1_w", "cv1_s", "cv1_b",
             "mb1_w", "mb1_s", "mb1_b",
             "mb2_w", "mb2_s", "mb2_b",
             "cv3_w", "cv2_w",
             "bn1_s", "bn1_b", "bn2_s", "bn2_b",
             "cv4_w", "cv4_s", "cv4_b")
    w_args = [packed[k] for k in order]

    in_specs = [pl.BlockSpec((C1, L), lambda g: (0, g)),
                pl.BlockSpec((8, L), lambda g: (0, 0))]
    for a in w_args:
        # Full-array weight blocks with a constant index map: DMA'd once and
        # kept resident across grid steps.
        in_specs.append(pl.BlockSpec(a.shape, lambda g, _nd=a.ndim: (0,) * _nd))

    kernel = functools.partial(_bottleneck_csp_kernel, W=W, n=n,
                               c_p=c_p, shortcut=shortcut)

    out = pl.pallas_call(
        kernel,
        out_shape=jax.ShapeDtypeStruct((c2_p, N_pad * HW), x_nchw.dtype),
        grid=(n_tiles,),
        in_specs=in_specs,
        out_specs=pl.BlockSpec((c2_p, L), lambda g: (0, g)),
        scratch_shapes=[pltpu.VMEM((9 * c_p, L), mdt)],
        compiler_params=pltpu.CompilerParams(
            dimension_semantics=("parallel",),
            vmem_limit_bytes=64 * 1024 * 1024),
    )(x, masks, *w_args)

    out = out.reshape(c2_p, N_pad, HW)
    out = jnp.transpose(out, (1, 0, 2))[:N, :c2]
    return out.reshape(N, c2, H, W)


# --------------------------- pure-JAX reference ----------------------------

def _conv2d_nchw(x, w):
    k = w.shape[-1]
    pad = k // 2
    return lax.conv_general_dilated(
        x, w, window_strides=(1, 1),
        padding=[(pad, pad), (pad, pad)],
        dimension_numbers=("NCHW", "OIHW", "NCHW"))


def _conv_bn_silu_ref(x, p):
    y = _conv2d_nchw(x, p["w"])
    y = y * p["scale"][None, :, None, None] + p["bias"][None, :, None, None]
    if p["act"]:
        y = y * jax.nn.sigmoid(y)
    return y


def bottleneck_csp_ref(x, P, shortcut=True):
    y = _conv_bn_silu_ref(x, P["cv1"])
    for blk in P["m"]:
        t = _conv_bn_silu_ref(_conv_bn_silu_ref(y, blk["cv1"]), blk["cv2"])
        y = y + t if shortcut else t
    y1 = _conv2d_nchw(y, P["cv3_w"])
    y2 = _conv2d_nchw(x, P["cv2_w"])
    z = jnp.concatenate([y1, y2], axis=1)
    z = z * P["bn_scale"][None, :, None, None] + P["bn_bias"][None, :, None, None]
    z = z * jax.nn.sigmoid(z)
    return _conv_bn_silu_ref(z, P["cv4"])


# ------------------------------ initialization ------------------------------

def _fold_bn(key, c):
    kg, kb, km, kv = jax.random.split(key, 4)
    gamma = 1.0 + 0.1 * jax.random.normal(kg, (c,), jnp.float32)
    beta = 0.1 * jax.random.normal(kb, (c,), jnp.float32)
    mean = 0.1 * jax.random.normal(km, (c,), jnp.float32)
    var = 1.0 + 0.1 * jax.random.uniform(kv, (c,), jnp.float32)
    eps = 1e-5                                   # nn.BatchNorm2d default
    scale = gamma / jnp.sqrt(var + eps)          # eval-mode BN fold
    bias = beta - mean * scale
    return scale, bias


def _init_conv_bn(key, cin, cout, k, act=True):
    kw, kbn = jax.random.split(key)
    w = 0.1 * jax.random.normal(kw, (cout, cin, k, k), jnp.float32)
    scale, bias = _fold_bn(kbn, cout)
    return dict(w=w, scale=scale, bias=bias, act=act)


def init_bottleneck_csp(key, c1, c2, n=1, e=0.5):
    c_ = int(c2 * e)
    ki = iter(jax.random.split(key, 5 + 2 * n))
    P = dict(
        cv1=_init_conv_bn(next(ki), c1, c_, 1),                       # Conv
        cv2_w=0.1 * jax.random.normal(next(ki), (c_, c1, 1, 1), jnp.float32),
        cv3_w=0.1 * jax.random.normal(next(ki), (c_, c_, 1, 1), jnp.float32),
        cv4=_init_conv_bn(next(ki), 2 * c_, c2, 1),                   # Conv
        m=[],
    )
    P["bn_scale"], P["bn_bias"] = _fold_bn(next(ki), 2 * c_)          # self.bn
    for _ in range(n):
        P["m"].append(dict(
            cv1=_init_conv_bn(next(ki), c_, c_, 1),                   # 1x1
            cv2=_init_conv_bn(next(ki), c_, c_, 3),                   # 3x3
        ))
    return P


def pack_params(P, matmul_dtype=jnp.bfloat16):
    """Precompute kernel-ready layouts once: 1x1 weights as (Co,Ci) matrices,
    3x3 weights as (Co, 9*c_p) im2col matrices, BN folded into per-row
    scale/bias columns, channels padded to full sublanes, concat + cv4 merged
    into a single matrix, and all matmul weights pre-cast to the MXU dtype."""
    mdt = matmul_dtype
    c_ = P["cv1"]["w"].shape[0]
    c2 = P["cv4"]["w"].shape[0]
    # Pad the hidden width to the sublane packing of the MXU dtype so every
    # slab write / matmul-output row block is a full, unmasked store.
    row_align = 8 if mdt == jnp.float32 else 16
    c_p = ((c_ + row_align - 1) // row_align) * row_align
    c2_p = ((c2 + 7) // 8) * 8

    def w1x1(w, rout, cin_p=None):          # OIHW (Co,Ci,1,1) -> (rout, cin_p)
        m = w[:, :, 0, 0]
        co, ci = m.shape
        cin_p = ci if cin_p is None else cin_p
        return jnp.pad(m, ((0, rout - co), (0, cin_p - ci))).astype(mdt)

    def sb(scale, bias, rout):              # -> (rout,1) f32; pad: scale=1, bias=0
        s = jnp.pad(scale, (0, rout - scale.shape[0]), constant_values=1.0)
        b = jnp.pad(bias, (0, rout - bias.shape[0]))
        return s[:, None].astype(jnp.float32), b[:, None].astype(jnp.float32)

    def w3x3(w):                            # OIHW (Co,Ci,3,3) -> (c_p, 9*c_p)
        co, ci = w.shape[0], w.shape[1]
        wt = jnp.transpose(w, (0, 2, 3, 1))               # (Co, kh, kw, Ci)
        wt = jnp.pad(wt, ((0, c_p - co), (0, 0), (0, 0), (0, c_p - ci)))
        return wt.reshape(c_p, 9 * c_p).astype(mdt)

    m = P["m"]
    cv1_s, cv1_b = sb(P["cv1"]["scale"], P["cv1"]["bias"], c_p)
    bn1_s, bn1_b = sb(P["bn_scale"][:c_], P["bn_bias"][:c_], c_p)
    bn2_s, bn2_b = sb(P["bn_scale"][c_:], P["bn_bias"][c_:], c_p)
    cv4_s, cv4_b = sb(P["cv4"]["scale"], P["cv4"]["bias"], c2_p)
    mb1_sb = [sb(b["cv1"]["scale"], b["cv1"]["bias"], c_p) for b in m]
    mb2_sb = [sb(b["cv2"]["scale"], b["cv2"]["bias"], c_p) for b in m]

    # cv4 input columns laid out to match the in-kernel stack [z1; z2] with
    # each half padded to c_p rows (concat + BN-of-concat folded at init).
    w4 = P["cv4"]["w"][:, :, 0, 0]                        # (c2, 2*c_)
    cv4_w = jnp.zeros((c2_p, 2 * c_p), jnp.float32)
    cv4_w = cv4_w.at[:c2, :c_].set(w4[:, :c_])
    cv4_w = cv4_w.at[:c2, c_p:c_p + c_].set(w4[:, c_:])

    return dict(
        cv1_w=w1x1(P["cv1"]["w"], c_p),
        cv1_s=cv1_s, cv1_b=cv1_b,
        mb1_w=jnp.stack([w1x1(b["cv1"]["w"], c_p, c_p) for b in m]),
        mb1_s=jnp.stack([s for s, _ in mb1_sb]),
        mb1_b=jnp.stack([b for _, b in mb1_sb]),
        mb2_w=jnp.stack([w3x3(b["cv2"]["w"]) for b in m]),
        mb2_s=jnp.stack([s for s, _ in mb2_sb]),
        mb2_b=jnp.stack([b for _, b in mb2_sb]),
        cv3_w=w1x1(P["cv3_w"], c_p, c_p),
        cv2_w=w1x1(P["cv2_w"], c_p),
        bn1_s=bn1_s, bn1_b=bn1_b, bn2_s=bn2_s, bn2_b=bn2_b,
        cv4_w=cv4_w.astype(mdt), cv4_s=cv4_s, cv4_b=cv4_b,
        c2=int(c2),
    )


# ----------------------------------- main -----------------------------------

if __name__ == "__main__":
    root = jax.random.PRNGKey(0)
    kp1, kp2, kx1, kx2 = jax.random.split(root, 4)

    # --- config 1: c1=c2=8, n=1 (c_=4), batch folded into 512 lanes ---------
    N, C1, H, W = 2, 8, 16, 16
    C2 = 8
    x = jax.random.normal(kx1, (N, C1, H, W), jnp.float32)   # NCHW like torch
    raw = init_bottleneck_csp(kp1, C1, C2, n=1, e=0.5)
    ref = bottleneck_csp_ref(x, raw)

    # f32 MXU path: tight check.
    out_f32 = jax.block_until_ready(
        bottleneck_csp_pallas(x, pack_params(raw, jnp.float32)))
    assert out_f32.shape == (N, C2, H, W), out_f32.shape
    err = float(jnp.max(jnp.abs(out_f32 - ref)))
    assert jnp.allclose(out_f32, ref, atol=1e-2, rtol=1e-2), err

    # bf16 MXU path (default; recommended on v5e/v6e/v7x), f32 accumulate.
    out_bf16 = jax.block_until_ready(bottleneck_csp_pallas(x, pack_params(raw)))
    err_bf16 = float(jnp.max(jnp.abs(out_bf16 - ref)))
    assert jnp.allclose(out_bf16, ref, atol=1e-1, rtol=1e-1), err_bf16

    # --- config 2: c1=8 -> c2=16, n=2 (c_=8), batch=1 ------------------------
    x2 = jax.random.normal(kx2, (1, 8, H, W), jnp.float32)
    raw2 = init_bottleneck_csp(kp2, 8, 16, n=2, e=0.5)
    out2 = jax.block_until_ready(
        bottleneck_csp_pallas(x2, pack_params(raw2, jnp.float32)))
    ref2 = bottleneck_csp_ref(x2, raw2)
    assert out2.shape == (1, 16, H, W), out2.shape
    err2 = float(jnp.max(jnp.abs(out2 - ref2)))
    assert jnp.allclose(out2, ref2, atol=1e-2, rtol=1e-2), err2

    print("KERNEL_OK")
</pallas_src>

<mosaic_0001>
module attributes {stable_mosaic.version = 11 : i64} {
  func.func @_bottleneck_csp_kernel(%arg0: i32, %arg1: memref<8x512xf32, #tpu.memory_space<vmem>>, %arg2: memref<8x512xf32, #tpu.memory_space<vmem>>, %arg3: memref<8x8xf32, #tpu.memory_space<vmem>>, %arg4: memref<8x1xf32, #tpu.memory_space<vmem>>, %arg5: memref<8x1xf32, #tpu.memory_space<vmem>>, %arg6: memref<1x8x8xf32, #tpu.memory_space<vmem>>, %arg7: memref<1x8x1xf32, #tpu.memory_space<vmem>>, %arg8: memref<1x8x1xf32, #tpu.memory_space<vmem>>, %arg9: memref<1x8x72xf32, #tpu.memory_space<vmem>>, %arg10: memref<1x8x1xf32, #tpu.memory_space<vmem>>, %arg11: memref<1x8x1xf32, #tpu.memory_space<vmem>>, %arg12: memref<8x8xf32, #tpu.memory_space<vmem>>, %arg13: memref<8x8xf32, #tpu.memory_space<vmem>>, %arg14: memref<8x1xf32, #tpu.memory_space<vmem>>, %arg15: memref<8x1xf32, #tpu.memory_space<vmem>>, %arg16: memref<8x1xf32, #tpu.memory_space<vmem>>, %arg17: memref<8x1xf32, #tpu.memory_space<vmem>>, %arg18: memref<8x16xf32, #tpu.memory_space<vmem>>, %arg19: memref<8x1xf32, #tpu.memory_space<vmem>>, %arg20: memref<8x1xf32, #tpu.memory_space<vmem>>, %arg21: memref<8x512xf32, #tpu.memory_space<vmem>>, %arg22: memref<72x512xf32, #tpu.memory_space<vmem>>) attributes {dimension_semantics = [#tpu.dimension_semantics<parallel>], iteration_bounds = array<i64: 1>, scalar_prefetch = 0 : i64, scratch_operands = 1 : i64, tpu.core_type = #tpu.core_type<tc>, window_params = [{transform_indices = @transform_0, window_bounds = array<i64: 8, 512>}, {pipeline_mode = #tpu.pipeline_mode<synchronous>, transform_indices = @transform_1, window_bounds = array<i64: 8, 512>}, {pipeline_mode = #tpu.pipeline_mode<synchronous>, transform_indices = @transform_2, window_bounds = array<i64: 8, 8>}, {pipeline_mode = #tpu.pipeline_mode<synchronous>, transform_indices = @transform_3, window_bounds = array<i64: 8, 1>}, {pipeline_mode = #tpu.pipeline_mode<synchronous>, transform_indices = @transform_4, window_bounds = array<i64: 8, 1>}, {pipeline_mode = #tpu.pipeline_mode<synchronous>, transform_indices = @transform_5, window_bounds = array<i64: 1, 8, 8>}, {pipeline_mode = #tpu.pipeline_mode<synchronous>, transform_indices = @transform_6, window_bounds = array<i64: 1, 8, 1>}, {pipeline_mode = #tpu.pipeline_mode<synchronous>, transform_indices = @transform_7, window_bounds = array<i64: 1, 8, 1>}, {pipeline_mode = #tpu.pipeline_mode<synchronous>, transform_indices = @transform_8, window_bounds = array<i64: 1, 8, 72>}, {pipeline_mode = #tpu.pipeline_mode<synchronous>, transform_indices = @transform_9, window_bounds = array<i64: 1, 8, 1>}, {pipeline_mode = #tpu.pipeline_mode<synchronous>, transform_indices = @transform_10, window_bounds = array<i64: 1, 8, 1>}, {pipeline_mode = #tpu.pipeline_mode<synchronous>, transform_indices = @transform_11, window_bounds = array<i64: 8, 8>}, {pipeline_mode = #tpu.pipeline_mode<synchronous>, transform_indices = @transform_12, window_bounds = array<i64: 8, 8>}, {pipeline_mode = #tpu.pipeline_mode<synchronous>, transform_indices = @transform_13, window_bounds = array<i64: 8, 1>}, {pipeline_mode = #tpu.pipeline_mode<synchronous>, transform_indices = @transform_14, window_bounds = array<i64: 8, 1>}, {pipeline_mode = #tpu.pipeline_mode<synchronous>, transform_indices = @transform_15, window_bounds = array<i64: 8, 1>}, {pipeline_mode = #tpu.pipeline_mode<synchronous>, transform_indices = @transform_16, window_bounds = array<i64: 8, 1>}, {pipeline_mode = #tpu.pipeline_mode<synchronous>, transform_indices = @transform_17, window_bounds = array<i64: 8, 16>}, {pipeline_mode = #tpu.pipeline_mode<synchronous>, transform_indices = @transform_18, window_bounds = array<i64: 8, 1>}, {pipeline_mode = #tpu.pipeline_mode<synchronous>, transform_indices = @transform_19, window_bounds = array<i64: 8, 1>}, {transform_indices = @transform_20, window_bounds = array<i64: 8, 512>}]} {
    %c0 = arith.constant 0 : index
    %c0_0 = arith.constant 0 : index
    %0 = vector.load %arg2[%c0, %c0_0] : memref<8x512xf32, #tpu.memory_space<vmem>>, vector<1x512xf32>
    %1 = vector.shape_cast %0 : vector<1x512xf32> to vector<1x512xf32>
    %2 = vector.broadcast %1 : vector<1x512xf32> to vector<8x512xf32>
    %c1 = arith.constant 1 : index
    %c0_1 = arith.constant 0 : index
    %3 = vector.load %arg2[%c1, %c0_1] : memref<8x512xf32, #tpu.memory_space<vmem>>, vector<1x512xf32>
    %4 = vector.shape_cast %3 : vector<1x512xf32> to vector<1x512xf32>
    %5 = vector.broadcast %4 : vector<1x512xf32> to vector<8x512xf32>
    %c2 = arith.constant 2 : index
    %c0_2 = arith.constant 0 : index
    %6 = vector.load %arg2[%c2, %c0_2] : memref<8x512xf32, #tpu.memory_space<vmem>>, vector<1x512xf32>
    %7 = vector.shape_cast %6 : vector<1x512xf32> to vector<1x512xf32>
    %8 = vector.broadcast %7 : vector<1x512xf32> to vector<8x512xf32>
    %c3 = arith.constant 3 : index
    %c0_3 = arith.constant 0 : index
    %9 = vector.load %arg2[%c3, %c0_3] : memref<8x512xf32, #tpu.memory_space<vmem>>, vector<1x512xf32>
    %10 = vector.shape_cast %9 : vector<1x512xf32> to vector<1x512xf32>
    %11 = vector.broadcast %10 : vector<1x512xf32> to vector<8x512xf32>
    %c4 = arith.constant 4 : index
    %c0_4 = arith.constant 0 : index
    %12 = vector.load %arg2[%c4, %c0_4] : memref<8x512xf32, #tpu.memory_space<vmem>>, vector<1x512xf32>
    %13 = vector.shape_cast %12 : vector<1x512xf32> to vector<1x512xf32>
    %14 = vector.broadcast %13 : vector<1x512xf32> to vector<8x512xf32>
    %c5 = arith.constant 5 : index
    %c0_5 = arith.constant 0 : index
    %15 = vector.load %arg2[%c5, %c0_5] : memref<8x512xf32, #tpu.memory_space<vmem>>, vector<1x512xf32>
    %16 = vector.shape_cast %15 : vector<1x512xf32> to vector<1x512xf32>
    %17 = vector.broadcast %16 : vector<1x512xf32> to vector<8x512xf32>
    %c6 = arith.constant 6 : index
    %c0_6 = arith.constant 0 : index
    %18 = vector.load %arg2[%c6, %c0_6] : memref<8x512xf32, #tpu.memory_space<vmem>>, vector<1x512xf32>
    %19 = vector.shape_cast %18 : vector<1x512xf32> to vector<1x512xf32>
    %20 = vector.broadcast %19 : vector<1x512xf32> to vector<8x512xf32>
    %c7 = arith.constant 7 : index
    %c0_7 = arith.constant 0 : index
    %21 = vector.load %arg2[%c7, %c0_7] : memref<8x512xf32, #tpu.memory_space<vmem>>, vector<1x512xf32>
    %22 = vector.shape_cast %21 : vector<1x512xf32> to vector<1x512xf32>
    %23 = vector.broadcast %22 : vector<1x512xf32> to vector<8x512xf32>
    %c0_8 = arith.constant 0 : index
    %c0_9 = arith.constant 0 : index
    %24 = vector.load %arg1[%c0_8, %c0_9] : memref<8x512xf32, #tpu.memory_space<vmem>>, vector<8x512xf32>
    %c0_10 = arith.constant 0 : index
    %c0_11 = arith.constant 0 : index
    %25 = vector.load %arg3[%c0_10, %c0_11] : memref<8x8xf32, #tpu.memory_space<vmem>>, vector<8x8xf32>
    %cst = arith.constant dense<0.000000e+00> : vector<8x512xf32>
    %26 = tpu.matmul %25, %24, %cst {dimension_numbers = #tpu.dot_dimension_numbers<[1], [0], [0], [1], [0, 0, 1, 1], [], []>} : vector<8x8xf32>, vector<8x512xf32>, vector<8x512xf32> -> vector<8x512xf32>
    %c0_12 = arith.constant 0 : index
    %c0_13 = arith.constant 0 : index
    %27 = vector.load %arg4[%c0_12, %c0_13] : memref<8x1xf32, #tpu.memory_space<vmem>>, vector<8x1xf32>
    %28 = vector.broadcast %27 : vector<8x1xf32> to vector<8x512xf32>
    %29 = arith.mulf %26, %28 : vector<8x512xf32>
    %c0_14 = arith.constant 0 : index
    %c0_15 = arith.constant 0 : index
    %30 = vector.load %arg5[%c0_14, %c0_15] : memref<8x1xf32, #tpu.memory_space<vmem>>, vector<8x1xf32>
    %31 = vector.broadcast %30 : vector<8x1xf32> to vector<8x512xf32>
    %32 = arith.addf %29, %31 : vector<8x512xf32>
    %33 = arith.negf %32 : vector<8x512xf32>
    %34 = math.exp %33 : vector<8x512xf32>
    %cst_16 = arith.constant 1.000000e+00 : f32
    %35 = vector.broadcast %cst_16 : f32 to vector<8x512xf32>
    %36 = arith.addf %35, %34 : vector<8x512xf32>
    %37 = arith.divf %35, %36 : vector<8x512xf32>
    %38 = arith.mulf %32, %37 : vector<8x512xf32>
    %c0_17 = arith.constant 0 : index
    %c0_18 = arith.constant 0 : index
    %c0_19 = arith.constant 0 : index
    %39 = vector.load %arg6[%c0_17, %c0_18, %c0_19] : memref<1x8x8xf32, #tpu.memory_space<vmem>>, vector<1x8x8xf32>
    %40 = vector.shape_cast %39 : vector<1x8x8xf32> to vector<8x8xf32>
    %cst_20 = arith.constant dense<0.000000e+00> : vector<8x512xf32>
    %41 = tpu.matmul %40, %38, %cst_20 {dimension_numbers = #tpu.dot_dimension_numbers<[1], [0], [0], [1], [0, 0, 1, 1], [], []>} : vector<8x8xf32>, vector<8x512xf32>, vector<8x512xf32> -> vector<8x512xf32>
    %c0_21 = arith.constant 0 : index
    %c0_22 = arith.constant 0 : index
    %c0_23 = arith.constant 0 : index
    %42 = vector.load %arg7[%c0_21, %c0_22, %c0_23] : memref<1x8x1xf32, #tpu.memory_space<vmem>>, vector<1x8x1xf32>
    %43 = vector.shape_cast %42 : vector<1x8x1xf32> to vector<8x1xf32>
    %44 = vector.broadcast %43 : vector<8x1xf32> to vector<8x512xf32>
    %45 = arith.mulf %41, %44 : vector<8x512xf32>
    %c0_24 = arith.constant 0 : index
    %c0_25 = arith.constant 0 : index
    %c0_26 = arith.constant 0 : index
    %46 = vector.load %arg8[%c0_24, %c0_25, %c0_26] : memref<1x8x1xf32, #tpu.memory_space<vmem>>, vector<1x8x1xf32>
    %47 = vector.shape_cast %46 : vector<1x8x1xf32> to vector<8x1xf32>
    %48 = vector.broadcast %47 : vector<8x1xf32> to vector<8x512xf32>
    %49 = arith.addf %45, %48 : vector<8x512xf32>
    %50 = arith.negf %49 : vector<8x512xf32>
    %51 = math.exp %50 : vector<8x512xf32>
    %cst_27 = arith.constant 1.000000e+00 : f32
    %52 = vector.broadcast %cst_27 : f32 to vector<8x512xf32>
    %53 = arith.addf %52, %51 : vector<8x512xf32>
    %54 = arith.divf %52, %53 : vector<8x512xf32>
    %55 = arith.mulf %49, %54 : vector<8x512xf32>
    %c0_28 = arith.constant 0 : index
    %c0_29 = arith.constant 0 : index
    %c0_30 = arith.constant 0 : index
    %56 = vector.load %arg9[%c0_28, %c0_29, %c0_30] : memref<1x8x72xf32, #tpu.memory_space<vmem>>, vector<1x8x72xf32>
    %57 = vector.shape_cast %56 : vector<1x8x72xf32> to vector<8x72xf32>
    %c0_31 = arith.constant 0 : index
    %c0_32 = arith.constant 0 : index
    %c0_33 = arith.constant 0 : index
    %58 = vector.load %arg10[%c0_31, %c0_32, %c0_33] : memref<1x8x1xf32, #tpu.memory_space<vmem>>, vector<1x8x1xf32>
    %59 = vector.shape_cast %58 : vector<1x8x1xf32> to vector<8x1xf32>
    %c0_34 = arith.constant 0 : index
    %c0_35 = arith.constant 0 : index
    %c0_36 = arith.constant 0 : index
    %60 = vector.load %arg11[%c0_34, %c0_35, %c0_36] : memref<1x8x1xf32, #tpu.memory_space<vmem>>, vector<1x8x1xf32>
    %61 = vector.shape_cast %60 : vector<1x8x1xf32> to vector<8x1xf32>
    %c17_i32 = arith.constant 17 : i32
    %62 = tpu.dynamic_rotate %55 by %c17_i32 dim 1 : vector<8x512xf32>, i32 -> vector<8x512xf32>
    %63 = arith.mulf %62, %2 : vector<8x512xf32>
    %c0_37 = arith.constant 0 : index
    %c0_38 = arith.constant 0 : index
    %64 = vector.load %arg22[%c0_37, %c0_38] : memref<72x512xf32, #tpu.memory_space<vmem>>, vector<8x512xf32>
    tpu.vector_store %arg22[%c0_37, %c0_38], %63 {strides = array<i32>} : memref<72x512xf32, #tpu.memory_space<vmem>>, vector<8x512xf32>,
    %c16_i32 = arith.constant 16 : i32
    %65 = tpu.dynamic_rotate %55 by %c16_i32 dim 1 : vector<8x512xf32>, i32 -> vector<8x512xf32>
    %66 = arith.mulf %65, %5 : vector<8x512xf32>
    %c8 = arith.constant 8 : index
    %c0_39 = arith.constant 0 : index
    %67 = vector.load %arg22[%c8, %c0_39] : memref<72x512xf32, #tpu.memory_space<vmem>>, vector<8x512xf32>
    tpu.vector_store %arg22[%c8, %c0_39], %66 {strides = array<i32>} : memref<72x512xf32, #tpu.memory_space<vmem>>, vector<8x512xf32>,
    %c15_i32 = arith.constant 15 : i32
    %68 = tpu.dynamic_rotate %55 by %c15_i32 dim 1 : vector<8x512xf32>, i32 -> vector<8x512xf32>
    %69 = arith.mulf %68, %8 : vector<8x512xf32>
    %c16 = arith.constant 16 : index
    %c0_40 = arith.constant 0 : index
    %70 = vector.load %arg22[%c16, %c0_40] : memref<72x512xf32, #tpu.memory_space<vmem>>, vector<8x512xf32>
    tpu.vector_store %arg22[%c16, %c0_40], %69 {strides = array<i32>} : memref<72x512xf32, #tpu.memory_space<vmem>>, vector<8x512xf32>,
    %c1_i32 = arith.constant 1 : i32
    %71 = tpu.dynamic_rotate %55 by %c1_i32 dim 1 : vector<8x512xf32>, i32 -> vector<8x512xf32>
    %72 = arith.mulf %71, %11 : vector<8x512xf32>
    %c24 = arith.constant 24 : index
    %c0_41 = arith.constant 0 : index
    %73 = vector.load %arg22[%c24, %c0_41] : memref<72x512xf32, #tpu.memory_space<vmem>>, vector<8x512xf32>
    tpu.vector_store %arg22[%c24, %c0_41], %72 {strides = array<i32>} : memref<72x512xf32, #tpu.memory_space<vmem>>, vector<8x512xf32>,
    %c32 = arith.constant 32 : index
    %c0_42 = arith.constant 0 : index
    %74 = vector.load %arg22[%c32, %c0_42] : memref<72x512xf32, #tpu.memory_space<vmem>>, vector<8x512xf32>
    tpu.vector_store %arg22[%c32, %c0_42], %55 {strides = array<i32>} : memref<72x512xf32, #tpu.memory_space<vmem>>, vector<8x512xf32>,
    %c511_i32 = arith.constant 511 : i32
    %75 = tpu.dynamic_rotate %55 by %c511_i32 dim 1 : vector<8x512xf32>, i32 -> vector<8x512xf32>
    %76 = arith.mulf %75, %14 : vector<8x512xf32>
    %c40 = arith.constant 40 : index
    %c0_43 = arith.constant 0 : index
    %77 = vector.load %arg22[%c40, %c0_43] : memref<72x512xf32, #tpu.memory_space<vmem>>, vector<8x512xf32>
    tpu.vector_store %arg22[%c40, %c0_43], %76 {strides = array<i32>} : memref<72x512xf32, #tpu.memory_space<vmem>>, vector<8x512xf32>,
    %c497_i32 = arith.constant 497 : i32
    %78 = tpu.dynamic_rotate %55 by %c497_i32 dim 1 : vector<8x512xf32>, i32 -> vector<8x512xf32>
    %79 = arith.mulf %78, %17 : vector<8x512xf32>
    %c48 = arith.constant 48 : index
    %c0_44 = arith.constant 0 : index
    %80 = vector.load %arg22[%c48, %c0_44] : memref<72x512xf32, #tpu.memory_space<vmem>>, vector<8x512xf32>
    tpu.vector_store %arg22[%c48, %c0_44], %79 {strides = array<i32>} : memref<72x512xf32, #tpu.memory_space<vmem>>, vector<8x512xf32>,
    %c496_i32 = arith.constant 496 : i32
    %81 = tpu.dynamic_rotate %55 by %c496_i32 dim 1 : vector<8x512xf32>, i32 -> vector<8x512xf32>
    %82 = arith.mulf %81, %20 : vector<8x512xf32>
    %c56 = arith.constant 56 : index
    %c0_45 = arith.constant 0 : index
    %83 = vector.load %arg22[%c56, %c0_45] : memref<72x512xf32, #tpu.memory_space<vmem>>, vector<8x512xf32>
    tpu.vector_store %arg22[%c56, %c0_45], %82 {strides = array<i32>} : memref<72x512xf32, #tpu.memory_space<vmem>>, vector<8x512xf32>,
    %c495_i32 = arith.constant 495 : i32
    %84 = tpu.dynamic_rotate %55 by %c495_i32 dim 1 : vector<8x512xf32>, i32 -> vector<8x512xf32>
    %85 = arith.mulf %84, %23 : vector<8x512xf32>
    %c64 = arith.constant 64 : index
    %c0_46 = arith.constant 0 : index
    %86 = vector.load %arg22[%c64, %c0_46] : memref<72x512xf32, #tpu.memory_space<vmem>>, vector<8x512xf32>
    tpu.vector_store %arg22[%c64, %c0_46], %85 {strides = array<i32>} : memref<72x512xf32, #tpu.memory_space<vmem>>, vector<8x512xf32>,
    %c0_47 = arith.constant 0 : index
    %c0_48 = arith.constant 0 : index
    %87 = vector.load %arg22[%c0_47, %c0_48] : memref<72x512xf32, #tpu.memory_space<vmem>>, vector<72x512xf32>
    %cst_49 = arith.constant dense<0.000000e+00> : vector<8x512xf32>
    %88 = tpu.matmul %57, %87, %cst_49 {dimension_numbers = #tpu.dot_dimension_numbers<[1], [0], [0], [1], [0, 0, 1, 1], [], []>} : vector<8x72xf32>, vector<72x512xf32>, vector<8x512xf32> -> vector<8x512xf32>
    %89 = vector.broadcast %59 : vector<8x1xf32> to vector<8x512xf32>
    %90 = arith.mulf %88, %89 : vector<8x512xf32>
    %91 = vector.broadcast %61 : vector<8x1xf32> to vector<8x512xf32>
    %92 = arith.addf %90, %91 : vector<8x512xf32>
    %93 = arith.negf %92 : vector<8x512xf32>
    %94 = math.exp %93 : vector<8x512xf32>
    %cst_50 = arith.constant 1.000000e+00 : f32
    %95 = vector.broadcast %cst_50 : f32 to vector<8x512xf32>
    %96 = arith.addf %95, %94 : vector<8x512xf32>
    %97 = arith.divf %95, %96 : vector<8x512xf32>
    %98 = arith.mulf %92, %97 : vector<8x512xf32>
    %99 = arith.addf %38, %98 : vector<8x512xf32>
    %c0_51 = arith.constant 0 : index
    %c0_52 = arith.constant 0 : index
    %100 = vector.load %arg12[%c0_51, %c0_52] : memref<8x8xf32, #tpu.memory_space<vmem>>, vector<8x8xf32>
    %cst_53 = arith.constant dense<0.000000e+00> : vector<8x512xf32>
    %101 = tpu.matmul %100, %99, %cst_53 {dimension_numbers = #tpu.dot_dimension_numbers<[1], [0], [0], [1], [0, 0, 1, 1], [], []>} : vector<8x8xf32>, vector<8x512xf32>, vector<8x512xf32> -> vector<8x512xf32>
    %c0_54 = arith.constant 0 : index
    %c0_55 = arith.constant 0 : index
    %102 = vector.load %arg13[%c0_54, %c0_55] : memref<8x8xf32, #tpu.memory_space<vmem>>, vector<8x8xf32>
    %cst_56 = arith.constant dense<0.000000e+00> : vector<8x512xf32>
    %103 = tpu.matmul %102, %24, %cst_56 {dimension_numbers = #tpu.dot_dimension_numbers<[1], [0], [0], [1], [0, 0, 1, 1], [], []>} : vector<8x8xf32>, vector<8x512xf32>, vector<8x512xf32> -> vector<8x512xf32>
    %c0_57 = arith.constant 0 : index
    %c0_58 = arith.constant 0 : index
    %104 = vector.load %arg14[%c0_57, %c0_58] : memref<8x1xf32, #tpu.memory_space<vmem>>, vector<8x1xf32>
    %105 = vector.broadcast %104 : vector<8x1xf32> to vector<8x512xf32>
    %106 = arith.mulf %101, %105 : vector<8x512xf32>
    %c0_59 = arith.constant 0 : index
    %c0_60 = arith.constant 0 : index
    %107 = vector.load %arg15[%c0_59, %c0_60] : memref<8x1xf32, #tpu.memory_space<vmem>>, vector<8x1xf32>
    %108 = vector.broadcast %107 : vector<8x1xf32> to vector<8x512xf32>
    %109 = arith.addf %106, %108 : vector<8x512xf32>
    %110 = arith.negf %109 : vector<8x512xf32>
    %111 = math.exp %110 : vector<8x512xf32>
    %cst_61 = arith.constant 1.000000e+00 : f32
    %112 = vector.broadcast %cst_61 : f32 to vector<8x512xf32>
    %113 = arith.addf %112, %111 : vector<8x512xf32>
    %114 = arith.divf %112, %113 : vector<8x512xf32>
    %115 = arith.mulf %109, %114 : vector<8x512xf32>
    %c0_62 = arith.constant 0 : index
    %c0_63 = arith.constant 0 : index
    %116 = vector.load %arg16[%c0_62, %c0_63] : memref<8x1xf32, #tpu.memory_space<vmem>>, vector<8x1xf32>
    %117 = vector.broadcast %116 : vector<8x1xf32> to vector<8x512xf32>
    %118 = arith.mulf %103, %117 : vector<8x512xf32>
    %c0_64 = arith.constant 0 : index
    %c0_65 = arith.constant 0 : index
    %119 = vector.load %arg17[%c0_64, %c0_65] : memref<8x1xf32, #tpu.memory_space<vmem>>, vector<8x1xf32>
    %120 = vector.broadcast %119 : vector<8x1xf32> to vector<8x512xf32>
    %121 = arith.addf %118, %120 : vector<8x512xf32>
    %122 = arith.negf %121 : vector<8x512xf32>
    %123 = math.exp %122 : vector<8x512xf32>
    %cst_66 = arith.constant 1.000000e+00 : f32
    %124 = vector.broadcast %cst_66 : f32 to vector<8x512xf32>
    %125 = arith.addf %124, %123 : vector<8x512xf32>
    %126 = arith.divf %124, %125 : vector<8x512xf32>
    %127 = arith.mulf %121, %126 : vector<8x512xf32>
    %c0_67 = arith.constant 0 : index
    %c0_68 = arith.constant 0 : index
    %128 = vector.load %arg22[%c0_67, %c0_68] : memref<72x512xf32, #tpu.memory_space<vmem>>, vector<8x512xf32>
    tpu.vector_store %arg22[%c0_67, %c0_68], %115 {strides = array<i32>} : memref<72x512xf32, #tpu.memory_space<vmem>>, vector<8x512xf32>,
    %c8_69 = arith.constant 8 : index
    %c0_70 = arith.constant 0 : index
    %129 = vector.load %arg22[%c8_69, %c0_70] : memref<72x512xf32, #tpu.memory_space<vmem>>, vector<8x512xf32>
    tpu.vector_store %arg22[%c8_69, %c0_70], %127 {strides = array<i32>} : memref<72x512xf32, #tpu.memory_space<vmem>>, vector<8x512xf32>,
    %c0_71 = arith.constant 0 : index
    %c0_72 = arith.constant 0 : index
    %130 = vector.load %arg18[%c0_71, %c0_72] : memref<8x16xf32, #tpu.memory_space<vmem>>, vector<8x16xf32>
    %c0_73 = arith.constant 0 : index
    %c0_74 = arith.constant 0 : index
    %131 = vector.load %arg22[%c0_73, %c0_74] : memref<72x512xf32, #tpu.memory_space<vmem>>, vector<16x512xf32>
    %cst_75 = arith.constant dense<0.000000e+00> : vector<8x512xf32>
    %132 = tpu.matmul %130, %131, %cst_75 {dimension_numbers = #tpu.dot_dimension_numbers<[1], [0], [0], [1], [0, 0, 1, 1], [], []>} : vector<8x16xf32>, vector<16x512xf32>, vector<8x512xf32> -> vector<8x512xf32>
    %c0_76 = arith.constant 0 : index
    %c0_77 = arith.constant 0 : index
    %133 = vector.load %arg19[%c0_76, %c0_77] : memref<8x1xf32, #tpu.memory_space<vmem>>, vector<8x1xf32>
    %134 = vector.broadcast %133 : vector<8x1xf32> to vector<8x512xf32>
    %135 = arith.mulf %132, %134 : vector<8x512xf32>
    %c0_78 = arith.constant 0 : index
    %c0_79 = arith.constant 0 : index
    %136 = vector.load %arg20[%c0_78, %c0_79] : memref<8x1xf32, #tpu.memory_space<vmem>>, vector<8x1xf32>
    %137 = vector.broadcast %136 : vector<8x1xf32> to vector<8x512xf32>
    %138 = arith.addf %135, %137 : vector<8x512xf32>
    %139 = arith.negf %138 : vector<8x512xf32>
    %140 = math.exp %139 : vector<8x512xf32>
    %cst_80 = arith.constant 1.000000e+00 : f32
    %141 = vector.broadcast %cst_80 : f32 to vector<8x512xf32>
    %142 = arith.addf %141, %140 : vector<8x512xf32>
    %143 = arith.divf %141, %142 : vector<8x512xf32>
    %144 = arith.mulf %138, %143 : vector<8x512xf32>
    %c0_81 = arith.constant 0 : index
    %c0_82 = arith.constant 0 : index
    %145 = vector.load %arg21[%c0_81, %c0_82] : memref<8x512xf32, #tpu.memory_space<vmem>>, vector<8x512xf32>
    tpu.vector_store %arg21[%c0_81, %c0_82], %144 {strides = array<i32>} : memref<8x512xf32, #tpu.memory_space<vmem>>, vector<8x512xf32>,
    return
  }
  func.func @transform_0(%arg0: i32) -> (i32, i32) {
    %c0_i32 = arith.constant 0 : i32
    %c0_i32_0 = arith.constant 0 : i32
    return %c0_i32, %arg0 : i32, i32
  }
  func.func @transform_1(%arg0: i32) -> (i32, i32) {
    %c0_i32 = arith.constant 0 : i32
    %c0_i32_0 = arith.constant 0 : i32
    %c0_i32_1 = arith.constant 0 : i32
    return %c0_i32, %c0_i32_0 : i32, i32
  }
  func.func @transform_2(%arg0: i32) -> (i32, i32) {
    %c0_i32 = arith.constant 0 : i32
    %c0_i32_0 = arith.constant 0 : i32
    %c0_i32_1 = arith.constant 0 : i32
    return %c0_i32, %c0_i32_0 : i32, i32
  }
  func.func @transform_3(%arg0: i32) -> (i32, i32) {
    %c0_i32 = arith.constant 0 : i32
    %c0_i32_0 = arith.constant 0 : i32
    %c0_i32_1 = arith.constant 0 : i32
    return %c0_i32, %c0_i32_0 : i32, i32
  }
  func.func @transform_4(%arg0: i32) -> (i32, i32) {
    %c0_i32 = arith.constant 0 : i32
    %c0_i32_0 = arith.constant 0 : i32
    %c0_i32_1 = arith.constant 0 : i32
    return %c0_i32, %c0_i32_0 : i32, i32
  }
  func.func @transform_5(%arg0: i32) -> (i32, i32, i32) {
    %c0_i32 = arith.constant 0 : i32
    %c0_i32_0 = arith.constant 0 : i32
    %c0_i32_1 = arith.constant 0 : i32
    %c0_i32_2 = arith.constant 0 : i32
    return %c0_i32, %c0_i32_0, %c0_i32_1 : i32, i32, i32
  }
  func.func @transform_6(%arg0: i32) -> (i32, i32, i32) {
    %c0_i32 = arith.constant 0 : i32
    %c0_i32_0 = arith.constant 0 : i32
    %c0_i32_1 = arith.constant 0 : i32
    %c0_i32_2 = arith.constant 0 : i32
    return %c0_i32, %c0_i32_0, %c0_i32_1 : i32, i32, i32
  }
  func.func @transform_7(%arg0: i32) -> (i32, i32, i32) {
    %c0_i32 = arith.constant 0 : i32
    %c0_i32_0 = arith.constant 0 : i32
    %c0_i32_1 = arith.constant 0 : i32
    %c0_i32_2 = arith.constant 0 : i32
    return %c0_i32, %c0_i32_0, %c0_i32_1 : i32, i32, i32
  }
  func.func @transform_8(%arg0: i32) -> (i32, i32, i32) {
    %c0_i32 = arith.constant 0 : i32
    %c0_i32_0 = arith.constant 0 : i32
    %c0_i32_1 = arith.constant 0 : i32
    %c0_i32_2 = arith.constant 0 : i32
    return %c0_i32, %c0_i32_0, %c0_i32_1 : i32, i32, i32
  }
  func.func @transform_9(%arg0: i32) -> (i32, i32, i32) {
    %c0_i32 = arith.constant 0 : i32
    %c0_i32_0 = arith.constant 0 : i32
    %c0_i32_1 = arith.constant 0 : i32
    %c0_i32_2 = arith.constant 0 : i32
    return %c0_i32, %c0_i32_0, %c0_i32_1 : i32, i32, i32
  }
  func.func @transform_10(%arg0: i32) -> (i32, i32, i32) {
    %c0_i32 = arith.constant 0 : i32
    %c0_i32_0 = arith.constant 0 : i32
    %c0_i32_1 = arith.constant 0 : i32
    %c0_i32_2 = arith.constant 0 : i32
    return %c0_i32, %c0_i32_0, %c0_i32_1 : i32, i32, i32
  }
  func.func @transform_11(%arg0: i32) -> (i32, i32) {
    %c0_i32 = arith.constant 0 : i32
    %c0_i32_0 = arith.constant 0 : i32
    %c0_i32_1 = arith.constant 0 : i32
    return %c0_i32, %c0_i32_0 : i32, i32
  }
  func.func @transform_12(%arg0: i32) -> (i32, i32) {
    %c0_i32 = arith.constant 0 : i32
    %c0_i32_0 = arith.constant 0 : i32
    %c0_i32_1 = arith.constant 0 : i32
    return %c0_i32, %c0_i32_0 : i32, i32
  }
  func.func @transform_13(%arg0: i32) -> (i32, i32) {
    %c0_i32 = arith.constant 0 : i32
    %c0_i32_0 = arith.constant 0 : i32
    %c0_i32_1 = arith.constant 0 : i32
    return %c0_i32, %c0_i32_0 : i32, i32
  }
  func.func @transform_14(%arg0: i32) -> (i32, i32) {
    %c0_i32 = arith.constant 0 : i32
    %c0_i32_0 = arith.constant 0 : i32
    %c0_i32_1 = arith.constant 0 : i32
    return %c0_i32, %c0_i32_0 : i32, i32
  }
  func.func @transform_15(%arg0: i32) -> (i32, i32) {
    %c0_i32 = arith.constant 0 : i32
    %c0_i32_0 = arith.constant 0 : i32
    %c0_i32_1 = arith.constant 0 : i32
    return %c0_i32, %c0_i32_0 : i32, i32
  }
  func.func @transform_16(%arg0: i32) -> (i32, i32) {
    %c0_i32 = arith.constant 0 : i32
    %c0_i32_0 = arith.constant 0 : i32
    %c0_i32_1 = arith.constant 0 : i32
    return %c0_i32, %c0_i32_0 : i32, i32
  }
  func.func @transform_17(%arg0: i32) -> (i32, i32) {
    %c0_i32 = arith.constant 0 : i32
    %c0_i32_0 = arith.constant 0 : i32
    %c0_i32_1 = arith.constant 0 : i32
    return %c0_i32, %c0_i32_0 : i32, i32
  }
  func.func @transform_18(%arg0: i32) -> (i32, i32) {
    %c0_i32 = arith.constant 0 : i32
    %c0_i32_0 = arith.constant 0 : i32
    %c0_i32_1 = arith.constant 0 : i32
    return %c0_i32, %c0_i32_0 : i32, i32
  }
  func.func @transform_19(%arg0: i32) -> (i32, i32) {
    %c0_i32 = arith.constant 0 : i32
    %c0_i32_0 = arith.constant 0 : i32
    %c0_i32_1 = arith.constant 0 : i32
    return %c0_i32, %c0_i32_0 : i32, i32
  }
  func.func @transform_20(%arg0: i32) -> (i32, i32) {
    %c0_i32 = arith.constant 0 : i32
    %c0_i32_0 = arith.constant 0 : i32
    return %c0_i32, %arg0 : i32, i32
  }
}

</mosaic_0001>

<bundles_post_ra>
// kernel: tpu_custom_call.1
= control target key start
LH: loop header
LB: loop body
LE: loop exit
PB: predicated region body
PF: predicated region fallthrough
CT: control target
= control target key end

     0   :  { %s3207_s0 = inlined_call_operand.hbm [shape: f32[8,512], index: 0, kind: input, shape index: {}]   ;;  %s3208_s1 = inlined_call_operand.hbm [shape: f32[8,512], index: 1, kind: input, shape index: {}]   ;;  %s3209_s2 = inlined_call_operand.hbm [shape: f32[8,8], index: 2, kind: input, shape index: {}]   ;;  %s3210_s3 = inlined_call_operand.hbm [shape: f32[8,1], index: 3, kind: input, shape index: {}]   ;;  %s3211_s4 = inlined_call_operand.hbm [shape: f32[8,1], index: 4, kind: input, shape index: {}]   ;;  %s3212_s5 = inlined_call_operand.hbm [shape: f32[1,8,8], index: 5, kind: input, shape index: {}]   ;;  %s3213_s6 = inlined_call_operand.hbm [shape: f32[1,8,1], index: 6, kind: input, shape index: {}]   ;;  %s3214_s7 = inlined_call_operand.hbm [shape: f32[1,8,1], index: 7, kind: input, shape index: {}]   ;;  %s3215_s8 = inlined_call_operand.hbm [shape: f32[1,8,72], index: 8, kind: input, shape index: {}]   ;;  %s3216_s9 = inlined_call_operand.hbm [shape: f32[1,8,1], index: 9, kind: input, shape index: {}]   ;;  %s3217_s10 = inlined_call_operand.hbm [shape: f32[1,8,1], index: 10, kind: input, shape index: {}]   ;;  %s3218_s11 = inlined_call_operand.hbm [shape: f32[8,8], index: 11, kind: input, shape index: {}]   ;;  %s3219_s12 = inlined_call_operand.hbm [shape: f32[8,8], index: 12, kind: input, shape index: {}]   ;;  %s3220_s13 = inlined_call_operand.hbm [shape: f32[8,1], index: 13, kind: input, shape index: {}]   ;;  %s3221_s14 = inlined_call_operand.hbm [shape: f32[8,1], index: 14, kind: input, shape index: {}]   ;;  %s3222_s15 = inlined_call_operand.hbm [shape: f32[8,1], index: 15, kind: input, shape index: {}]   ;;  %s3223_s16 = inlined_call_operand.hbm [shape: f32[8,1], index: 16, kind: input, shape index: {}]   ;;  %s3224_s17 = inlined_call_operand.hbm [shape: f32[8,16], index: 17, kind: input, shape index: {}]   ;;  %s3225_s18 = inlined_call_operand.hbm [shape: f32[8,1], index: 18, kind: input, shape index: {}]   ;;  %s3226_s19 = inlined_call_operand.hbm [shape: f32[8,1], index: 19, kind: input, shape index: {}]   ;;  %s3227_s20 = inlined_call_operand.hbm [shape: f32[8,512], index: 20, kind: output, shape index: {}]  }
   0x1   :  { %3233 = sst [smem:[#allocation48_spill]] %s3207_s0 }
   0x2   :  { %3234 = sst [smem:[#allocation49_spill]] %s3208_s1 }
   0x3   :  { %3235 = sst [smem:[#allocation50_spill]] %s3209_s2 }
   0x4   :  { %3236 = sst [smem:[#allocation51_spill]] %s3210_s3 }
   0x5   :  { %3237 = sst [smem:[#allocation52_spill]] %s3211_s4 }
   0x6   :  { %25 = vsyncpa [#allocation4], 0 }
   0x7   :  { %26 = vsyncpa [#allocation7], 0 }
   0x8   :  { %27 = vsyncpa [#allocation10], 0 }
   0x9   :  { %28 = vsyncpa [#allocation13], 0 }
   0xa   :  { %29 = vsyncpa [#allocation16], 0 }
   0xb   :  { %30 = vsyncpa [#allocation19], 0 }
   0xc   :  { %31 = vsyncpa [#allocation22], 0 }
   0xd   :  { %32 = vsyncpa [#allocation25], 0 }
   0xe   :  { %33 = vsyncpa [#allocation28], 0 }
   0xf   :  { %34 = vsyncpa [#allocation31], 0 }
  0x10   :  { %35 = vsyncpa [#allocation34], 0 }
  0x11   :  { %36 = vsyncpa [#allocation5], 0  ;;  %s2601_s1 = smov [#allocation6]   ;;  %s2602_s23 = smov [#allocation9]  }
  0x12   :  { %s53_s22 = sshll.u32 %s2601_s1, 4  ;;  %s73_s24 = sshll.u32 %s2602_s23, 4  ;;  %s54_s22 = int_to_ptr.vmem [resolvable:$true] %s53_s22  ;;  %s74_s24 = int_to_ptr.vmem [resolvable:$true] %s73_s24 }
  0x13   :  { %s3238_s3 = sld [smem:[#allocation49_spill]] }
  0x19   :  { %s2115_s26 = scalar_lea.hbm %s3238_s3, 512 }
  0x1a   :  { %p2116_p0 = scmp.ne.s32.totalorder %s3238_s3, %s2115_s26  ;;  %p2119_p1 = scmp.lt.u32.totalorder %s2115_s26, %s3238_s3 }
  0x1c   :  { %p2121_p2 = pnand %p2119_p1, %p2116_p0 }
  0x1e   :  { %2124 = shalt.err (!%p2121_p2)
}
  0x1f   :  { %s2125_s30 = scalar_lea.vmem %s54_s22, 512  ;;  %p2130_p4 = scmp.lt.s32.totalorder %s54_s22, %s54_s22 }
  0x20   :  { %p2126_p3 = scmp.ne.s32.totalorder %s54_s22, %s2125_s30  ;;  %p2131_p5 = scmp.lt.s32.totalorder %s2125_s30, %s2125_s30 }
  0x22   :  { %p2132_p6 = por %p2131_p5, %p2130_p4 }
  0x24   :  { %p2133_p7 = pnand %p2132_p6, %p2126_p3 }
  0x26   :  { %2136 = shalt.err (!%p2133_p7)
}
  0x27   :  { %56 = dma.hbm_to_vmem [thread:$0]  %s3238_s3, 512, %s54_s22, [#allocation7]  }
  0x28   :  { %s3239_s2 = sld [smem:[#allocation51_spill]] }
  0x2e   :  { %s2137_s25 = scalar_lea.hbm %s3239_s2, 128 }
  0x2f   :  { %p2138_p8 = scmp.ne.s32.totalorder %s3239_s2, %s2137_s25  ;;  %p2141_p9 = scmp.lt.u32.totalorder %s2137_s25, %s3239_s2 }
  0x31   :  { %p2143_p10 = pnand %p2141_p9, %p2138_p8 }
  0x33   :  { %2146 = shalt.err (!%p2143_p10)
}
  0x34   :  { %s2147_s29 = scalar_lea.vmem %s74_s24, 128  ;;  %p2152_p12 = scmp.lt.s32.totalorder %s74_s24, %s74_s24 }
  0x35   :  { %p2148_p11 = scmp.ne.s32.totalorder %s74_s24, %s2147_s29  ;;  %p2153_p13 = scmp.lt.s32.totalorder %s2147_s29, %s2147_s29 }
  0x37   :  { %p2154_p0 = por %p2153_p13, %p2152_p12 }
  0x39   :  { %p2155_p1 = pnand %p2154_p0, %p2148_p11 }
  0x3b   :  { %2158 = shalt.err (!%p2155_p1)
}
  0x3c   :  { %76 = dma.hbm_to_vmem [thread:$0]  %s3239_s2, 128, %s74_s24, [#allocation10]  }
  0x3d   :  { %s2603_s30 = smov [#allocation12]   ;;  %s2604_s21 = smov [#allocation15]  }
  0x3e   :  { %s93_s0 = sshll.u32 %s2603_s30, 4  ;;  %s113_s1 = sshll.u32 %s2604_s21, 4  ;;  %s94_s0 = int_to_ptr.vmem [resolvable:$true] %s93_s0  ;;  %s114_s1 = int_to_ptr.vmem [resolvable:$true] %s113_s1 }
  0x3f   :  { %s2159_s27 = scalar_lea.hbm %s3212_s5, 128 }
  0x40   :  { %p2160_p2 = scmp.ne.s32.totalorder %s3212_s5, %s2159_s27  ;;  %p2163_p3 = scmp.lt.u32.totalorder %s2159_s27, %s3212_s5 }
  0x42   :  { %p2165_p4 = pnand %p2163_p3, %p2160_p2 }
  0x44   :  { %2168 = shalt.err (!%p2165_p4)
}
  0x45   :  { %s2169_s24 = scalar_lea.vmem %s94_s0, 128  ;;  %p2174_p6 = scmp.lt.s32.totalorder %s94_s0, %s94_s0 }
  0x46   :  { %p2170_p5 = scmp.ne.s32.totalorder %s94_s0, %s2169_s24  ;;  %p2175_p7 = scmp.lt.s32.totalorder %s2169_s24, %s2169_s24 }
  0x48   :  { %p2176_p8 = por %p2175_p7, %p2174_p6 }
  0x4a   :  { %p2177_p9 = pnand %p2176_p8, %p2170_p5 }
  0x4c   :  { %2180 = shalt.err (!%p2177_p9)
}
  0x4d   :  { %96 = dma.hbm_to_vmem [thread:$0]  %s3212_s5, 128, %s94_s0, [#allocation13]  }
  0x4e   :  { %s2181_s21 = scalar_lea.hbm %s3214_s7, 128 }
  0x4f   :  { %p2182_p10 = scmp.ne.s32.totalorder %s3214_s7, %s2181_s21  ;;  %p2185_p11 = scmp.lt.u32.totalorder %s2181_s21, %s3214_s7 }
  0x51   :  { %p2187_p12 = pnand %p2185_p11, %p2182_p10 }
  0x53   :  { %2190 = shalt.err (!%p2187_p12)
}
  0x54   :  { %s2191_s26 = scalar_lea.vmem %s114_s1, 128  ;;  %p2196_p0 = scmp.lt.s32.totalorder %s114_s1, %s114_s1 }
  0x55   :  { %p2192_p13 = scmp.ne.s32.totalorder %s114_s1, %s2191_s26  ;;  %p2197_p1 = scmp.lt.s32.totalorder %s2191_s26, %s2191_s26 }
  0x57   :  { %p2198_p2 = por %p2197_p1, %p2196_p0 }
  0x59   :  { %p2199_p3 = pnand %p2198_p2, %p2192_p13 }
  0x5b   :  { %2202 = shalt.err (!%p2199_p3)
}
  0x5c   :  { %116 = dma.hbm_to_vmem [thread:$0]  %s3214_s7, 128, %s114_s1, [#allocation16]  }
  0x5d   :  { %s2605_s4 = smov [#allocation18]   ;;  %s2606_s24 = smov [#allocation21]  }
  0x5e   :  { %s133_s29 = sshll.u32 %s2605_s4, 4  ;;  %s153_s2 = sshll.u32 %s2606_s24, 4  ;;  %s134_s29 = int_to_ptr.vmem [resolvable:$true] %s133_s29  ;;  %s154_s2 = int_to_ptr.vmem [resolvable:$true] %s153_s2 }
  0x5f   :  { %s2203_s30 = scalar_lea.hbm %s3216_s9, 128 }
  0x60   :  { %p2204_p4 = scmp.ne.s32.totalorder %s3216_s9, %s2203_s30  ;;  %p2207_p5 = scmp.lt.u32.totalorder %s2203_s30, %s3216_s9 }
  0x62   :  { %p2209_p6 = pnand %p2207_p5, %p2204_p4 }
  0x64   :  { %2212 = shalt.err (!%p2209_p6)
}
  0x65   :  { %s2213_s7 = scalar_lea.vmem %s134_s29, 128  ;;  %p2218_p8 = scmp.lt.s32.totalorder %s134_s29, %s134_s29 }
  0x66   :  { %p2214_p7 = scmp.ne.s32.totalorder %s134_s29, %s2213_s7  ;;  %p2219_p9 = scmp.lt.s32.totalorder %s2213_s7, %s2213_s7 }
  0x68   :  { %p2220_p10 = por %p2219_p9, %p2218_p8 }
  0x6a   :  { %p2221_p11 = pnand %p2220_p10, %p2214_p7 }
  0x6c   :  { %2224 = shalt.err (!%p2221_p11)
}
  0x6d   :  { %136 = dma.hbm_to_vmem [thread:$0]  %s3216_s9, 128, %s134_s29, [#allocation19]  }
  0x6e   :  { %s2225_s0 = scalar_lea.hbm %s3218_s11, 128 }
  0x6f   :  { %p2226_p12 = scmp.ne.s32.totalorder %s3218_s11, %s2225_s0  ;;  %p2229_p13 = scmp.lt.u32.totalorder %s2225_s0, %s3218_s11 }
  0x71   :  { %p2231_p0 = pnand %p2229_p13, %p2226_p12 }
  0x73   :  { %2234 = shalt.err (!%p2231_p0)
}
  0x74   :  { %s2235_s30 = scalar_lea.vmem %s154_s2, 128  ;;  %p2240_p2 = scmp.lt.s32.totalorder %s154_s2, %s154_s2 }
  0x75   :  { %p2236_p1 = scmp.ne.s32.totalorder %s154_s2, %s2235_s30  ;;  %p2241_p3 = scmp.lt.s32.totalorder %s2235_s30, %s2235_s30 }
  0x77   :  { %p2242_p4 = por %p2241_p3, %p2240_p2 }
  0x79   :  { %p2243_p5 = pnand %p2242_p4, %p2236_p1 }
  0x7b   :  { %2246 = shalt.err (!%p2243_p5)
}
  0x7c   :  { %156 = dma.hbm_to_vmem [thread:$0]  %s3218_s11, 128, %s154_s2, [#allocation22]  }
  0x7d   :  { %s2607_s21 = smov [#allocation24]   ;;  %s2608_s25 = smov [#allocation27]  }
  0x7e   :  { %s173_s23 = sshll.u32 %s2607_s21, 4  ;;  %s193_s27 = sshll.u32 %s2608_s25, 4  ;;  %s174_s23 = int_to_ptr.vmem [resolvable:$true] %s173_s23  ;;  %s194_s27 = int_to_ptr.vmem [resolvable:$true] %s193_s27 }
  0x7f   :  { %s2247_s28 = scalar_lea.hbm %s3220_s13, 128 }
  0x80   :  { %p2248_p6 = scmp.ne.s32.totalorder %s3220_s13, %s2247_s28  ;;  %p2251_p7 = scmp.lt.u32.totalorder %s2247_s28, %s3220_s13 }
  0x82   :  { %p2253_p8 = pnand %p2251_p7, %p2248_p6 }
  0x84   :  { %2256 = shalt.err (!%p2253_p8)
}
  0x85   :  { %s2257_s11 = scalar_lea.vmem %s174_s23, 128  ;;  %p2262_p10 = scmp.lt.s32.totalorder %s174_s23, %s174_s23 }
  0x86   :  { %p2258_p9 = scmp.ne.s32.totalorder %s174_s23, %s2257_s11  ;;  %p2263_p11 = scmp.lt.s32.totalorder %s2257_s11, %s2257_s11 }
  0x88   :  { %p2264_p12 = por %p2263_p11, %p2262_p10 }
  0x8a   :  { %p2265_p13 = pnand %p2264_p12, %p2258_p9 }
  0x8c   :  { %2268 = shalt.err (!%p2265_p13)
}
  0x8d   :  { %176 = dma.hbm_to_vmem [thread:$0]  %s3220_s13, 128, %s174_s23, [#allocation25]  }
  0x8e   :  { %s2269_s30 = scalar_lea.hbm %s3222_s15, 128 }
  0x8f   :  { %p2270_p0 = scmp.ne.s32.totalorder %s3222_s15, %s2269_s30  ;;  %p2273_p1 = scmp.lt.u32.totalorder %s2269_s30, %s3222_s15 }
  0x91   :  { %p2275_p2 = pnand %p2273_p1, %p2270_p0 }
  0x93   :  { %2278 = shalt.err (!%p2275_p2)
}
  0x94   :  { %s2279_s7 = scalar_lea.vmem %s194_s27, 128  ;;  %p2284_p4 = scmp.lt.s32.totalorder %s194_s27, %s194_s27 }
  0x95   :  { %p2280_p3 = scmp.ne.s32.totalorder %s194_s27, %s2279_s7  ;;  %p2285_p5 = scmp.lt.s32.totalorder %s2279_s7, %s2279_s7 }
  0x97   :  { %p2286_p6 = por %p2285_p5, %p2284_p4 }
  0x99   :  { %p2287_p7 = pnand %p2286_p6, %p2280_p3 }
  0x9b   :  { %2290 = shalt.err (!%p2287_p7)
}
  0x9c   :  { %196 = dma.hbm_to_vmem [thread:$0]  %s3222_s15, 128, %s194_s27, [#allocation28]  }
  0x9d   :  { %s2609_s1 = smov [#allocation30]   ;;  %s2610_s26 = smov [#allocation3]  }
  0x9e   :  { %s213_s28 = sshll.u32 %s2609_s1, 4  ;;  %s43_s5 = sshll.u32 %s2610_s26, 4  ;;  %s214_s28 = int_to_ptr.vmem [resolvable:$true] %s213_s28  ;;  %s44_s5 = int_to_ptr.vmem [resolvable:$true] %s43_s5 }
  0x9f   :  { %s2291_s11 = scalar_lea.hbm %s3224_s17, 128 }
  0xa0   :  { %p2292_p8 = scmp.ne.s32.totalorder %s3224_s17, %s2291_s11  ;;  %p2295_p9 = scmp.lt.u32.totalorder %s2291_s11, %s3224_s17 }
  0xa2   :  { %p2297_p10 = pnand %p2295_p9, %p2292_p8 }
  0xa4   :  { %2300 = shalt.err (!%p2297_p10)
}
  0xa5   :  { %s2301_s15 = scalar_lea.vmem %s214_s28, 128  ;;  %p2306_p12 = scmp.lt.s32.totalorder %s214_s28, %s214_s28 }
  0xa6   :  { %p2302_p11 = scmp.ne.s32.totalorder %s214_s28, %s2301_s15  ;;  %p2307_p13 = scmp.lt.s32.totalorder %s2301_s15, %s2301_s15 }
  0xa8   :  { %p2308_p0 = por %p2307_p13, %p2306_p12 }
  0xaa   :  { %p2309_p1 = pnand %p2308_p0, %p2302_p11 }
  0xac   :  { %2312 = shalt.err (!%p2309_p1)
}
  0xad   :  { %216 = dma.hbm_to_vmem [thread:$0]  %s3224_s17, 128, %s214_s28, [#allocation31]  }
  0xae   :  { %s3240_s21 = sld [smem:[#allocation48_spill]] }
  0xb4   :  { %s2313_s25 = scalar_lea.hbm %s3240_s21, 512 }
  0xb5   :  { %p2314_p2 = scmp.ne.s32.totalorder %s3240_s21, %s2313_s25  ;;  %p2317_p3 = scmp.lt.u32.totalorder %s2313_s25, %s3240_s21 }
  0xb7   :  { %p2319_p4 = pnand %p2317_p3, %p2314_p2 }
  0xb9   :  { %2322 = shalt.err (!%p2319_p4)
}
  0xba   :  { %s2323_s26 = scalar_lea.vmem %s44_s5, 512  ;;  %p2328_p6 = scmp.lt.s32.totalorder %s44_s5, %s44_s5 }
  0xbb   :  { %p2324_p5 = scmp.ne.s32.totalorder %s44_s5, %s2323_s26  ;;  %p2329_p7 = scmp.lt.s32.totalorder %s2323_s26, %s2323_s26 }
  0xbd   :  { %p2330_p8 = por %p2329_p7, %p2328_p6 }
  0xbf   :  { %p2331_p9 = pnand %p2330_p8, %p2324_p5 }
  0xc1   :  { %2334 = shalt.err (!%p2331_p9)
}
  0xc2   :  { %46 = dma.hbm_to_vmem [thread:$0]  %s3240_s21, 512, %s44_s5, [#allocation4]  }
  0xc3   :  { %s2611_s0 = smov [#allocation8]   ;;  %s2612_s11 = smov [#allocation11]  }
  0xc4   :  { %s63_s4 = sshll.u32 %s2611_s0, 4  ;;  %s83_s2 = sshll.u32 %s2612_s11, 4  ;;  %s64_s4 = int_to_ptr.vmem [resolvable:$true] %s63_s4  ;;  %s84_s2 = int_to_ptr.vmem [resolvable:$true] %s83_s2 }
  0xc5   :  { %s3241_s3 = sld [smem:[#allocation50_spill]] }
  0xcb   :  { %s2335_s15 = scalar_lea.hbm %s3241_s3, 128 }
  0xcc   :  { %p2336_p10 = scmp.ne.s32.totalorder %s3241_s3, %s2335_s15  ;;  %p2339_p11 = scmp.lt.u32.totalorder %s2335_s15, %s3241_s3 }
  0xce   :  { %p2341_p12 = pnand %p2339_p11, %p2336_p10 }
  0xd0   :  { %2344 = shalt.err (!%p2341_p12)
}
  0xd1   :  { %s2345_s5 = scalar_lea.vmem %s64_s4, 128  ;;  %p2350_p0 = scmp.lt.s32.totalorder %s64_s4, %s64_s4 }
  0xd2   :  { %p2346_p13 = scmp.ne.s32.totalorder %s64_s4, %s2345_s5  ;;  %p2351_p1 = scmp.lt.s32.totalorder %s2345_s5, %s2345_s5 }
  0xd4   :  { %p2352_p2 = por %p2351_p1, %p2350_p0 }
  0xd6   :  { %p2353_p3 = pnand %p2352_p2, %p2346_p13 }
  0xd8   :  { %2356 = shalt.err (!%p2353_p3)
}
  0xd9   :  { %66 = dma.hbm_to_vmem [thread:$0]  %s3241_s3, 128, %s64_s4, [#allocation7]  }
  0xda   :  { %s3242_s23 = sld [smem:[#allocation52_spill]] }
  0xe0   :  { %s2357_s1 = scalar_lea.hbm %s3242_s23, 128 }
  0xe1   :  { %p2358_p4 = scmp.ne.s32.totalorder %s3242_s23, %s2357_s1  ;;  %p2361_p5 = scmp.lt.u32.totalorder %s2357_s1, %s3242_s23 }
  0xe3   :  { %p2363_p6 = pnand %p2361_p5, %p2358_p4 }
  0xe5   :  { %2366 = shalt.err (!%p2363_p6)
}
  0xe6   :  { %s2367_s11 = scalar_lea.vmem %s84_s2, 128  ;;  %p2372_p8 = scmp.lt.s32.totalorder %s84_s2, %s84_s2 }
  0xe7   :  { %p2368_p7 = scmp.ne.s32.totalorder %s84_s2, %s2367_s11  ;;  %p2373_p9 = scmp.lt.s32.totalorder %s2367_s11, %s2367_s11 }
  0xe9   :  { %p2374_p10 = por %p2373_p9, %p2372_p8 }
  0xeb   :  { %p2375_p11 = pnand %p2374_p10, %p2368_p7 }
  0xed   :  { %2378 = shalt.err (!%p2375_p11)
}
  0xee   :  { %86 = dma.hbm_to_vmem [thread:$0]  %s3242_s23, 128, %s84_s2, [#allocation10]  }
  0xef   :  { %s2613_s22 = smov [#allocation14]   ;;  %s2614_s15 = smov [#allocation17]  }
  0xf0   :  { %s103_s3 = sshll.u32 %s2613_s22, 4  ;;  %s123_s27 = sshll.u32 %s2614_s15, 4  ;;  %s104_s3 = int_to_ptr.vmem [resolvable:$true] %s103_s3  ;;  %s124_s27 = int_to_ptr.vmem [resolvable:$true] %s123_s27 }
  0xf1   :  { %s2379_s29 = scalar_lea.hbm %s3213_s6, 128 }
  0xf2   :  { %p2380_p12 = scmp.ne.s32.totalorder %s3213_s6, %s2379_s29  ;;  %p2383_p13 = scmp.lt.u32.totalorder %s2379_s29, %s3213_s6 }
  0xf4   :  { %p2385_p0 = pnand %p2383_p13, %p2380_p12 }
  0xf6   :  { %2388 = shalt.err (!%p2385_p0)
}
  0xf7   :  { %s2389_s2 = scalar_lea.vmem %s104_s3, 128  ;;  %p2394_p2 = scmp.lt.s32.totalorder %s104_s3, %s104_s3 }
  0xf8   :  { %p2390_p1 = scmp.ne.s32.totalorder %s104_s3, %s2389_s2  ;;  %p2395_p3 = scmp.lt.s32.totalorder %s2389_s2, %s2389_s2 }
  0xfa   :  { %p2396_p4 = por %p2395_p3, %p2394_p2 }
  0xfc   :  { %p2397_p5 = pnand %p2396_p4, %p2390_p1 }
  0xfe   :  { %2400 = shalt.err (!%p2397_p5)
}
  0xff   :  { %106 = dma.hbm_to_vmem [thread:$0]  %s3213_s6, 128, %s104_s3, [#allocation13]  }
 0x100   :  { %s2401_s17 = scalar_lea.hbm %s3215_s8, 128 }
 0x101   :  { %p2402_p6 = scmp.ne.s32.totalorder %s3215_s8, %s2401_s17  ;;  %p2405_p7 = scmp.lt.u32.totalorder %s2401_s17, %s3215_s8 }
 0x103   :  { %p2407_p8 = pnand %p2405_p7, %p2402_p6 }
 0x105   :  { %2410 = shalt.err (!%p2407_p8)
}
 0x106   :  { %s2411_s24 = scalar_lea.vmem %s124_s27, 128  ;;  %p2416_p10 = scmp.lt.s32.totalorder %s124_s27, %s124_s27 }
 0x107   :  { %p2412_p9 = scmp.ne.s32.totalorder %s124_s27, %s2411_s24  ;;  %p2417_p11 = scmp.lt.s32.totalorder %s2411_s24, %s2411_s24 }
 0x109   :  { %p2418_p12 = por %p2417_p11, %p2416_p10 }
 0x10b   :  { %p2419_p13 = pnand %p2418_p12, %p2412_p9 }
 0x10d   :  { %2422 = shalt.err (!%p2419_p13)
}
 0x10e   :  { %126 = dma.hbm_to_vmem [thread:$0]  %s3215_s8, 128, %s124_s27, [#allocation16]  }
 0x10f   :  { %s2615_s3 = smov [#allocation20]   ;;  %s2616_s30 = smov [#allocation23]  }
 0x110   :  { %s143_s15 = sshll.u32 %s2615_s3, 4  ;;  %s163_s9 = sshll.u32 %s2616_s30, 4  ;;  %s144_s15 = int_to_ptr.vmem [resolvable:$true] %s143_s15  ;;  %s164_s9 = int_to_ptr.vmem [resolvable:$true] %s163_s9 }
 0x111   :  { %s2423_s21 = scalar_lea.hbm %s3217_s10, 128 }
 0x112   :  { %p2424_p0 = scmp.ne.s32.totalorder %s3217_s10, %s2423_s21  ;;  %p2427_p1 = scmp.lt.u32.totalorder %s2423_s21, %s3217_s10 }
 0x114   :  { %p2429_p2 = pnand %p2427_p1, %p2424_p0 }
 0x116   :  { %2432 = shalt.err (!%p2429_p2)
}
 0x117   :  { %s2433_s8 = scalar_lea.vmem %s144_s15, 128  ;;  %p2438_p4 = scmp.lt.s32.totalorder %s144_s15, %s144_s15 }
 0x118   :  { %p2434_p3 = scmp.ne.s32.totalorder %s144_s15, %s2433_s8  ;;  %p2439_p5 = scmp.lt.s32.totalorder %s2433_s8, %s2433_s8 }
 0x11a   :  { %p2440_p6 = por %p2439_p5, %p2438_p4 }
 0x11c   :  { %p2441_p7 = pnand %p2440_p6, %p2434_p3 }
 0x11e   :  { %2444 = shalt.err (!%p2441_p7)
}
 0x11f   :  { %146 = dma.hbm_to_vmem [thread:$0]  %s3217_s10, 128, %s144_s15, [#allocation19]  }
 0x120   :  { %s2445_s17 = scalar_lea.hbm %s3219_s12, 128 }
 0x121   :  { %p2446_p8 = scmp.ne.s32.totalorder %s3219_s12, %s2445_s17  ;;  %p2449_p9 = scmp.lt.u32.totalorder %s2445_s17, %s3219_s12 }
 0x123   :  { %p2451_p10 = pnand %p2449_p9, %p2446_p8 }
 0x125   :  { %2454 = shalt.err (!%p2451_p10)
}
 0x126   :  { %s2455_s24 = scalar_lea.vmem %s164_s9, 128  ;;  %p2460_p12 = scmp.lt.s32.totalorder %s164_s9, %s164_s9 }
 0x127   :  { %p2456_p11 = scmp.ne.s32.totalorder %s164_s9, %s2455_s24  ;;  %p2461_p13 = scmp.lt.s32.totalorder %s2455_s24, %s2455_s24 }
 0x129   :  { %p2462_p0 = por %p2461_p13, %p2460_p12 }
 0x12b   :  { %p2463_p1 = pnand %p2462_p0, %p2456_p11 }
 0x12d   :  { %2466 = shalt.err (!%p2463_p1)
}
 0x12e   :  { %166 = dma.hbm_to_vmem [thread:$0]  %s3219_s12, 128, %s164_s9, [#allocation22]  }
 0x12f   :  { %s2617_s22 = smov [#allocation26]   ;;  %s2618_s15 = smov [#allocation29]  }
 0x130   :  { %s183_s3 = sshll.u32 %s2617_s22, 4  ;;  %s203_s30 = sshll.u32 %s2618_s15, 4  ;;  %s184_s3 = int_to_ptr.vmem [resolvable:$true] %s183_s3  ;;  %s204_s30 = int_to_ptr.vmem [resolvable:$true] %s203_s30 }
 0x131   :  { %s2467_s21 = scalar_lea.hbm %s3221_s14, 128 }
 0x132   :  { %p2468_p2 = scmp.ne.s32.totalorder %s3221_s14, %s2467_s21  ;;  %p2471_p3 = scmp.lt.u32.totalorder %s2467_s21, %s3221_s14 }
 0x134   :  { %p2473_p4 = pnand %p2471_p3, %p2468_p2 }
 0x136   :  { %2476 = shalt.err (!%p2473_p4)
}
 0x137   :  { %s2477_s12 = scalar_lea.vmem %s184_s3, 128  ;;  %p2482_p6 = scmp.lt.s32.totalorder %s184_s3, %s184_s3 }
 0x138   :  { %p2478_p5 = scmp.ne.s32.totalorder %s184_s3, %s2477_s12  ;;  %p2483_p7 = scmp.lt.s32.totalorder %s2477_s12, %s2477_s12 }
 0x13a   :  { %p2484_p8 = por %p2483_p7, %p2482_p6 }
 0x13c   :  { %p2485_p9 = pnand %p2484_p8, %p2478_p5 }
 0x13e   :  { %2488 = shalt.err (!%p2485_p9)
}
 0x13f   :  { %186 = dma.hbm_to_vmem [thread:$0]  %s3221_s14, 128, %s184_s3, [#allocation25]  }
 0x140   :  { %s2489_s1 = scalar_lea.hbm %s3223_s16, 128 }
 0x141   :  { %p2490_p10 = scmp.ne.s32.totalorder %s3223_s16, %s2489_s1  ;;  %p2493_p11 = scmp.lt.u32.totalorder %s2489_s1, %s3223_s16 }
 0x143   :  { %p2495_p12 = pnand %p2493_p11, %p2490_p10 }
 0x145   :  { %2498 = shalt.err (!%p2495_p12)
}
 0x146   :  { %s2499_s11 = scalar_lea.vmem %s204_s30, 128  ;;  %p2504_p0 = scmp.lt.s32.totalorder %s204_s30, %s204_s30 }
 0x147   :  { %p2500_p13 = scmp.ne.s32.totalorder %s204_s30, %s2499_s11  ;;  %p2505_p1 = scmp.lt.s32.totalorder %s2499_s11, %s2499_s11 }
 0x149   :  { %p2506_p2 = por %p2505_p1, %p2504_p0 }
 0x14b   :  { %p2507_p3 = pnand %p2506_p2, %p2500_p13 }
 0x14d   :  { %2510 = shalt.err (!%p2507_p3)
}
 0x14e   :  { %206 = dma.hbm_to_vmem [thread:$0]  %s3223_s16, 128, %s204_s30, [#allocation28]  }
 0x14f   :  { %s2619_s24 = smov [#allocation32]   ;;  %s2620_s6 = smov [#allocation33]  }
 0x150   :  { %s223_s10 = sshll.u32 %s2619_s24, 4  ;;  %s233_s22 = sshll.u32 %s2620_s6, 4  ;;  %s224_s10 = int_to_ptr.vmem [resolvable:$true] %s223_s10  ;;  %s234_s22 = int_to_ptr.vmem [resolvable:$true] %s233_s22 }
 0x151   :  { %s2511_s29 = scalar_lea.hbm %s3225_s18, 128 }
 0x152   :  { %p2512_p4 = scmp.ne.s32.totalorder %s3225_s18, %s2511_s29  ;;  %p2515_p5 = scmp.lt.u32.totalorder %s2511_s29, %s3225_s18 }
 0x154   :  { %p2517_p6 = pnand %p2515_p5, %p2512_p4 }
 0x156   :  { %2520 = shalt.err (!%p2517_p6)
}
 0x157   :  { %s2521_s16 = scalar_lea.vmem %s224_s10, 128  ;;  %p2526_p8 = scmp.lt.s32.totalorder %s224_s10, %s224_s10 }
 0x158   :  { %p2522_p7 = scmp.ne.s32.totalorder %s224_s10, %s2521_s16  ;;  %p2527_p9 = scmp.lt.s32.totalorder %s2521_s16, %s2521_s16 }
 0x15a   :  { %p2528_p10 = por %p2527_p9, %p2526_p8 }
 0x15c   :  { %p2529_p11 = pnand %p2528_p10, %p2522_p7 }
 0x15e   :  { %2532 = shalt.err (!%p2529_p11)
}
 0x15f   :  { %226 = dma.hbm_to_vmem [thread:$0]  %s3225_s18, 128, %s224_s10, [#allocation31]  }
 0x160   :  { %s2533_s9 = scalar_lea.hbm %s3226_s19, 128 }
 0x161   :  { %p2534_p12 = scmp.ne.s32.totalorder %s3226_s19, %s2533_s9  ;;  %p2537_p13 = scmp.lt.u32.totalorder %s2533_s9, %s3226_s19 }
 0x163   :  { %p2539_p0 = pnand %p2537_p13, %p2534_p12 }
 0x165   :  { %2542 = shalt.err (!%p2539_p0)
}
 0x166   :  { %s2543_s26 = scalar_lea.vmem %s234_s22, 128  ;;  %p2548_p2 = scmp.lt.s32.totalorder %s234_s22, %s234_s22 }
 0x167   :  { %p2544_p1 = scmp.ne.s32.totalorder %s234_s22, %s2543_s26  ;;  %p2549_p3 = scmp.lt.s32.totalorder %s2543_s26, %s2543_s26 }
 0x169   :  { %p2550_p4 = por %p2549_p3, %p2548_p2 }
 0x16b   :  { %p2551_p5 = pnand %p2550_p4, %p2544_p1 }
 0x16d   :  { %2554 = shalt.err (!%p2551_p5)
}
 0x16e   :  { %236 = dma.hbm_to_vmem [thread:$0]  %s3226_s19, 128, %s234_s22, [#allocation34]  }
 0x16f   :  { %2577 = dma.done.wait [#allocation4], 512  }
 0x170   :  { %2578 = vsyncadd [#allocation4], 4294966784 }
 0x171   :  { %2579 = dma.done.wait [#allocation7], 640  }
 0x172   :  { %2580 = vsyncadd [#allocation7], 4294966656 }
 0x173   :  { %2581 = dma.done.wait [#allocation10], 256  }
 0x174   :  { %2582 = vsyncadd [#allocation10], 4294967040 }
 0x175   :  { %2583 = dma.done.wait [#allocation13], 256  }
 0x176   :  { %2584 = vsyncadd [#allocation13], 4294967040 }
 0x177   :  { %2585 = dma.done.wait [#allocation16], 256  }
 0x178   :  { %2586 = vsyncadd [#allocation16], 4294967040 }
 0x179   :  { %2587 = dma.done.wait [#allocation19], 256  }
 0x17a   :  { %2588 = vsyncadd [#allocation19], 4294967040 }
 0x17b   :  { %2589 = dma.done.wait [#allocation22], 256  }
 0x17c   :  { %2590 = vsyncadd [#allocation22], 4294967040 }
 0x17d   :  { %2591 = dma.done.wait [#allocation25], 256  }
 0x17e   :  { %2592 = vsyncadd [#allocation25], 4294967040 }
 0x17f   :  { %2593 = dma.done.wait [#allocation28], 256  }
 0x180   :  { %2594 = vsyncadd [#allocation28], 4294967040 }
 0x181   :  { %2595 = dma.done.wait [#allocation31], 256  }
 0x182   :  { %2596 = vsyncadd [#allocation31], 4294967040 }
 0x183   :  { %2597 = dma.done.wait [#allocation34], 128  }
 0x184   :  { %2598 = vsyncadd [#allocation34], 4294967168  ;;  %v2621_v0 = vmov 0.0   ;;  %v2622_v1 = vmov 0   ;;  %v2979_v2 = vld [vmem:[#allocation3 + $0x8] sm:$0xff]  ;;  %v2981_v3 = vld [vmem:[#allocation3 + $0x18] sm:$0xff] }
 0x185   :  { %553 = vmatprep.mubr.f32.mxu0 %v2621_v0  ;;  %624 = vmatprep.mubr.f32.mxu1 %v2621_v0  ;;  %v2983_v4 = vld [vmem:[#allocation3] sm:$0xff]  ;;  %vm485_vm0 = vcmask 64512   ;;  %v2987_v5 = vld [vmem:[#allocation3 + $0x10] sm:$0xff]  ;;  %v631_v7 = vld [vmem:[#allocation9] sm:$0xff]  ;;  %s2623_s19 = smov 17   ;;  %s2624_s28 = smov 16  }
 0x186   :  { %2017 = vset.pattern.permute.xlu0 %v2622_v1  ;;  %2018 = vset.pattern.permute.xlu1 %v2622_v1  ;;  %v484_v6 = vld [vmem:[#allocation8] sm:$0xff]  ;;  %v641_v8 = vld [vmem:[#allocation11] sm:$0xff]  ;;  %v835_v10 = vld [vmem:[#allocation15] sm:$0xff]  ;;  %s2625_s0 = smov 15   ;;  %s2626_s11 = smov 1   ;;  %vm1086_vm9 = vcmask 588800  }
 0x187   :  { %489 = vmatprep.subr.mxu0 %v2979_v2  ;;  %560 = vmatprep.subr.mxu1 %v2981_v3  ;;  %v825_v9 = vld [vmem:[#allocation14] sm:$0xff]  ;;  %v679_v44 = vld [vmem:[#allocation12] sm:$0xff]  ;;  %s2627_s14 = smov 127   ;;  %s2628_s4 = smov 113   ;;  %vm1687_vm10 = vcmask 130048  }
 0x188   :  { %490 = vmatpush1.msra.mxu0 %v2983_v4  ;;  %561 = vmatpush1.msra.mxu1 %v2987_v5  ;;  %s2629_s24 = smov 112   ;;  %s2630_s10 = smov 111  }
 0x189   :  { %1910 = vmatmul.mubr.msk.f32.vlgmr.msra.gmra.mrb[0].mxu0 %vm485_vm0, %v484_v6  ;;  %1911 = vmatmul.mubr.msk.f32.vlgmr.msra.gmra.mrb[0].mxu1 %vm485_vm0, %v484_v6  ;;  %s2631_s6 = smov [#allocation35]  }
 0x18a   :  { %634 = vperm.xlu0 %2017, %v631_v7   ;;  %747 = vmatprep.mubr.f32.mxu0 %v2621_v0  ;;  %s1891_s22 = sshll.u32 %s2631_s6, 4  ;;  %s1892_s22 = int_to_ptr.vmem [resolvable:$true] %s1891_s22 }
 0x18b   :  { %818 = vmatprep.mubr.f32.mxu1 %v2621_v0  ;;  %828 = vperm.xlu1 %2018, %v825_v9   ;;  %s2555_s3 = scalar_lea.vmem %s1892_s22, 512  ;;  %p2560_p7 = scmp.lt.s32.totalorder %s1892_s22, %s1892_s22 }
 0x18c   :  { %p2556_p6 = scmp.ne.s32.totalorder %s1892_s22, %s2555_s3  ;;  %p2561_p8 = scmp.lt.s32.totalorder %s2555_s3, %s2555_s3 }
 0x18e   :  { %644 = vperm.xlu0 %2017, %v641_v8   ;;  %p2562_p9 = por %p2561_p8, %p2560_p7 }
 0x18f   :  { %838 = vperm.xlu1 %2018, %v835_v10  }
 0x190   :  { %p2563_p10 = pnand %p2562_p9, %p2556_p6 }
 0x209   :  { %v635_v11 = vpop.permute.xlu0 %634 }
 0x20a   :  { %v829_v46 = vpop.permute.xlu1 %828 }
 0x20d   :  { %v645_v18 = vpop.permute.xlu0 %644 }
 0x20e   :  { %v839_v51 = vpop.permute.xlu1 %838 }
 0x25c   :  { %v555_v12 = vpop.f32.mrb[0].mxu0  ;;  %v626_v13 = vpop.f32.mrb[0].mxu1 }
 0x25d   :  { %v637_v14 = vmul.f32 %v635_v11, %v555_v12  ;;  %v639_v15 = vmul.f32 %v635_v11, %v626_v13  ;;  %v557_v16 = vpop.f32.mrb[1].mxu0  ;;  %v628_v17 = vpop.f32.mrb[1].mxu1 }
 0x25e   :  { %v638_v19 = vmul.f32 %v635_v11, %v557_v16  ;;  %v640_v20 = vmul.f32 %v635_v11, %v628_v17 }
 0x25f   :  { %v647_v21 = vadd.f32 %v645_v18, %v637_v14  ;;  %v649_v22 = vadd.f32 %v645_v18, %v639_v15 }
 0x260   :  { %v648_v23 = vadd.f32 %v645_v18, %v638_v19  ;;  %v650_v24 = vadd.f32 %v645_v18, %v640_v20 }
 0x261   :  { %v1912_v25 = vmul.f32 -1.442695, %v647_v21  ;;  %v1914_v26 = vmul.f32 -1.442695, %v649_v22 }
 0x262   :  { %v1913_v27 = vmul.f32 -1.442695, %v648_v23  ;;  %v1915_v28 = vmul.f32 -1.442695, %v650_v24 }
 0x263   :  { %2019 = vpow2.f32 %v1912_v25  ;;  %v1584_v25 = vld [vmem:[#allocation26] sm:$0xff] }
 0x264   :  { %2021 = vpow2.f32 %v1914_v26  ;;  %v1632_v26 = vld [vmem:[#allocation29] sm:$0xff] }
 0x265   :  { %2023 = vpow2.f32 %v1913_v27  ;;  %v1833_v27 = vld [vmem:[#allocation32] sm:$0xff] }
 0x266   :  { %2025 = vpow2.f32 %v1915_v28  ;;  %v1843_v28 = vld [vmem:[#allocation33] sm:$0xff] }
 0x26d   :  { %v2020_v29 = vpop.eup %2019 }
 0x26e   :  { %v2022_v30 = vpop.eup %2021  ;;  %v663_v31 = vadd.f32 1.0, %v2020_v29  ;;  %v299_v29 = vlaneseq }
 0x26f   :  { %v2024_v32 = vpop.eup %2023  ;;  %v665_v33 = vadd.f32 1.0, %v2022_v30 }
 0x270   :  { %v2026_v34 = vpop.eup %2025  ;;  %2027 = vrcp.f32 %v663_v31  ;;  %v664_v35 = vadd.f32 1.0, %v2024_v32  ;;  %v300_v31 = vshrl.u32 %v299_v29, 7  ;;  %v3051_v32 = vand.u32 127, %v299_v29 }
 0x271   :  { %2029 = vrcp.f32 %v665_v33  ;;  %v666_v36 = vadd.f32 1.0, %v2026_v34 }
 0x272   :  { %2031 = vrcp.f32 %v664_v35  ;;  %v3053_v34 = vsub.s32 1, %v300_v31  ;;  %vm886_vm1 = vcmp.lt.s32.totalorder %v3051_v32, 17  ;;  %vm907_vm2 = vcmp.lt.s32.totalorder %v3051_v32, 16 }
 0x273   :  { %2033 = vrcp.f32 %v666_v36  ;;  %v297_v36 = vld [vmem:[#allocation6] ss:$8 sm:$0xf]  ;;  %vm928_vm3 = vcmp.lt.s32.totalorder %v3051_v32, 15  ;;  %vm949_vm4 = vcmp.lt.s32.totalorder %v3051_v32, 1  ;;  %vm974_vm5 = vcmp.lt.s32.totalorder %v3051_v32, 127 }
 0x274   :  { %vm1016_vm6 = vcmp.lt.s32.totalorder %v3051_v32, 112  ;;  %vm995_vm7 = vcmp.lt.s32.totalorder %v3051_v32, 113  ;;  %vm1037_vm8 = vcmp.lt.s32.totalorder %v3051_v32, 111 }
 0x27a   :  { %v2028_v37 = vpop.eup %2027 }
 0x27b   :  { %v2030_v38 = vpop.eup %2029  ;;  %v2997_v42 = vmul.f32 %v2028_v37, %v647_v21  ;;  %v874_v21 = vld [vmem:[#allocation18] sm:$0xff] }
 0x27c   :  { %v2032_v39 = vpop.eup %2031  ;;  %v3001_v45 = vmul.f32 %v2030_v38, %v649_v22  ;;  %v875_v22 = vld [vmem:[#allocation20] sm:$0xff] }
 0x27d   :  { %v2034_v40 = vpop.eup %2033  ;;  %v2995_v41 = vmul.f32 %v2032_v39, %v648_v23  ;;  %v1574_v23 = vld [vmem:[#allocation24] sm:$0xff]  ;;  %v3056_v39 = vsub.s32 0, %v300_v31 }
 0x27e   :  { %v2999_v43 = vmul.f32 %v2034_v40, %v650_v24  ;;  %v1622_v24 = vld [vmem:[#allocation27] sm:$0xff]  ;;  %v3058_v40 = vsub.s32 3, %v300_v31 }
 0x27f   :  { %683 = vmatprep.subr.mxu0 %v2995_v41  ;;  %v320_v37 = vld [vmem:[#allocation6 + $0x1] ss:$8 sm:$0xf] }
 0x280   :  { %754 = vmatprep.subr.mxu1 %v2999_v43  ;;  %684 = vmatpush1.msra.mxu0 %v2997_v42 }
 0x281   :  { %755 = vmatpush1.msra.mxu1 %v3001_v45  ;;  %1916 = vmatmul.mubr.msk.f32.vlgmr.msra.gmra.mrb[2].mxu0 %vm485_vm0, %v679_v44 }
 0x282   :  { %1917 = vmatmul.mubr.msk.f32.vlgmr.msra.gmra.mrb[2].mxu1 %vm485_vm0, %v679_v44  ;;  %1154 = vmatprep.mubr.f32.mxu0 %v2621_v0  ;;  %v306_v44 = vrot.slane %v297_v36, %v3053_v34 }
 0x283   :  { %1225 = vmatprep.mubr.f32.mxu1 %v2621_v0 }
 0x354   :  { %v749_v47 = vpop.f32.mrb[2].mxu0 }
 0x355   :  { %v831_v48 = vmul.f32 %v829_v46, %v749_v47  ;;  %v820_v49 = vpop.f32.mrb[2].mxu1  ;;  %v751_v50 = vpop.f32.mrb[3].mxu0  ;;  %v329_v47 = vrot.slane %v320_v37, %v3053_v34 }
 0x356   :  { %v833_v52 = vmul.f32 %v829_v46, %v820_v49  ;;  %v832_v53 = vmul.f32 %v829_v46, %v751_v50  ;;  %v822_v54 = vpop.f32.mrb[3].mxu1  ;;  %v3065_v49 = vsub.s32 2, %v300_v31 }
 0x357   :  { %v841_v55 = vadd.f32 %v839_v51, %v831_v48  ;;  %v834_v56 = vmul.f32 %v829_v46, %v822_v54 }
 0x358   :  { %v843_v57 = vadd.f32 %v839_v51, %v833_v52  ;;  %v842_v58 = vadd.f32 %v839_v51, %v832_v53  ;;  %v314_v52 = vrot.slane %v297_v36, %v3058_v40  ;;  %v333_v54 = vrot.slane %v320_v37, %v3065_v49 }
 0x359   :  { %v1918_v59 = vmul.f32 -1.442695, %v841_v55  ;;  %v844_v60 = vadd.f32 %v839_v51, %v834_v56  ;;  %v302_v51 = vrot.slane %v297_v36, %v3056_v39 }
 0x35a   :  { %v1920_v61 = vmul.f32 -1.442695, %v843_v57  ;;  %v1919_v62 = vmul.f32 -1.442695, %v842_v58 }
 0x35b   :  { %2035 = vpow2.f32 %v1918_v59  ;;  %v1921_v63 = vmul.f32 -1.442695, %v844_v60  ;;  %v337_v59 = vrot.slane %v320_v37, %v3058_v40 }
 0x35c   :  { %2037 = vpow2.f32 %v1920_v61 }
 0x35d   :  { %2039 = vpow2.f32 %v1919_v62 }
 0x35e   :  { %2041 = vpow2.f32 %v1921_v63 }
 0x365   :  { %v2036_v1 = vpop.eup %2035 }
 0x366   :  { %v2038_v6 = vpop.eup %2037  ;;  %v857_v7 = vadd.f32 1.0, %v2036_v1 }
 0x367   :  { %v2040_v8 = vpop.eup %2039  ;;  %v859_v9 = vadd.f32 1.0, %v2038_v6 }
 0x368   :  { %v2042_v10 = vpop.eup %2041  ;;  %2043 = vrcp.f32 %v857_v7  ;;  %v858_v11 = vadd.f32 1.0, %v2040_v8 }
 0x369   :  { %2045 = vrcp.f32 %v859_v9  ;;  %v860_v12 = vadd.f32 1.0, %v2042_v10 }
 0x36a   :  { %2047 = vrcp.f32 %v858_v11 }
 0x36b   :  { %2049 = vrcp.f32 %v860_v12 }
 0x372   :  { %v2044_v13 = vpop.eup %2043 }
 0x373   :  { %v2046_v14 = vpop.eup %2045  ;;  %v3011_v15 = vmul.f32 %v2044_v13, %v841_v55 }
 0x374   :  { %v2048_v16 = vpop.eup %2047  ;;  %v3016_v19 = vmul.f32 %v2046_v14, %v843_v57 }
 0x375   :  { %v3013_v17 = vmul.f32 %v2048_v16, %v842_v58  ;;  %876 = vrot.lane.b32.xlu0 %v3011_v15, %s2623_s19  ;;  %v2050_v18 = vpop.eup %2049  ;;  %v325_v58 = vrot.slane %v320_v37, %v3056_v39 }
 0x376   :  { %v3019_v20 = vmul.f32 %v2050_v18, %v844_v60  ;;  %v310_v60 = vrot.slane %v297_v36, %v3065_v49 }
 0x377   :  { %878 = vrot.lane.b32.xlu1 %v3013_v17, %s2623_s19 }
 0x379   :  { %880 = vrot.lane.b32.xlu0 %v3016_v19, %s2623_s19 }
 0x37b   :  { %882 = vrot.lane.b32.xlu1 %v3019_v20, %s2623_s19 }
 0x37d   :  { %899 = vrot.lane.b32.xlu0 %v3011_v15, %s2624_s28 }
 0x37f   :  { %901 = vrot.lane.b32.xlu1 %v3013_v17, %s2624_s28 }
 0x381   :  { %903 = vrot.lane.b32.xlu0 %v3016_v19, %s2624_s28 }
 0x383   :  { %905 = vrot.lane.b32.xlu1 %v3019_v20, %s2624_s28 }
 0x385   :  { %920 = vrot.lane.b32.xlu0 %v3011_v15, %s2625_s0 }
 0x387   :  { %922 = vrot.lane.b32.xlu1 %v3013_v17, %s2625_s0 }
 0x389   :  { %924 = vrot.lane.b32.xlu0 %v3016_v19, %s2625_s0 }
 0x38b   :  { %926 = vrot.lane.b32.xlu1 %v3019_v20, %s2625_s0 }
 0x38d   :  { %941 = vrot.lane.b32.xlu0 %v3011_v15, %s2626_s11 }
 0x38f   :  { %943 = vrot.lane.b32.xlu1 %v3013_v17, %s2626_s11 }
 0x391   :  { %945 = vrot.lane.b32.xlu0 %v3016_v19, %s2626_s11 }
 0x393   :  { %947 = vrot.lane.b32.xlu1 %v3019_v20, %s2626_s11 }
 0x395   :  { %966 = vrot.lane.b32.xlu0 %v3011_v15, %s2627_s14 }
 0x397   :  { %968 = vrot.lane.b32.xlu1 %v3013_v17, %s2627_s14 }
 0x399   :  { %970 = vrot.lane.b32.xlu0 %v3016_v19, %s2627_s14 }
 0x39b   :  { %972 = vrot.lane.b32.xlu1 %v3019_v20, %s2627_s14 }
 0x39d   :  { %987 = vrot.lane.b32.xlu0 %v3011_v15, %s2628_s4 }
 0x39f   :  { %989 = vrot.lane.b32.xlu1 %v3013_v17, %s2628_s4 }
 0x3a1   :  { %991 = vrot.lane.b32.xlu0 %v3016_v19, %s2628_s4 }
 0x3a3   :  { %993 = vrot.lane.b32.xlu1 %v3019_v20, %s2628_s4 }
 0x3a5   :  { %1008 = vrot.lane.b32.xlu0 %v3011_v15, %s2629_s24 }
 0x3a7   :  { %1010 = vrot.lane.b32.xlu1 %v3013_v17, %s2629_s24 }
 0x3a9   :  { %1012 = vrot.lane.b32.xlu0 %v3016_v19, %s2629_s24 }
 0x3ab   :  { %1014 = vrot.lane.b32.xlu1 %v3019_v20, %s2629_s24 }
 0x3ad   :  { %1029 = vrot.lane.b32.xlu0 %v3011_v15, %s2630_s10 }
 0x3af   :  { %1031 = vrot.lane.b32.xlu1 %v3013_v17, %s2630_s10 }
 0x3b1   :  { %1033 = vrot.lane.b32.xlu0 %v3016_v19, %s2630_s10 }
 0x3b3   :  { %1035 = vrot.lane.b32.xlu1 %v3019_v20, %s2630_s10 }
 0x3b5   :  { %1234 = vperm.xlu0 %2017, %v874_v21  }
 0x3b7   :  { %1243 = vperm.xlu1 %2018, %v875_v22  }
 0x3b9   :  { %1577 = vperm.xlu0 %2017, %v1574_v23  }
 0x3bb   :  { %1625 = vperm.xlu1 %2018, %v1622_v24  }
 0x3bd   :  { %1587 = vperm.xlu0 %2017, %v1584_v25  }
 0x3bf   :  { %1635 = vperm.xlu1 %2018, %v1632_v26   ;;  %v343_v26 = vld [vmem:[#allocation6 + $0x2] ss:$8 sm:$0xf] }
 0x3c0   :  { %v352_v29 = vrot.slane %v343_v26, %v3053_v34  ;;  %v348_v36 = vrot.slane %v343_v26, %v3056_v39  ;;  %v360_v37 = vrot.slane %v343_v26, %v3058_v40 }
 0x3c1   :  { %1836 = vperm.xlu0 %2017, %v1833_v27   ;;  %v366_v27 = vld [vmem:[#allocation6 + $0x3] ss:$8 sm:$0xf] }
 0x3c2   :  { %v375_v31 = vrot.slane %v366_v27, %v3053_v34 }
 0x3c3   :  { %1846 = vperm.xlu1 %2018, %v1843_v28  }
 0x3e7   :  { %v877_v30 = vpop.permute.xlu0 %876 }
 0x3e9   :  { %v879_v33 = vpop.permute.xlu1 %878 }
 0x3ea   :  { %v889_v48 = vsel %vm886_vm1, %v877_v30, %v879_v33 }
 0x3eb   :  { %v881_v35 = vpop.permute.xlu0 %880  ;;  %v892_v55 = vmul.f32 %v889_v48, %v306_v44  ;;  %v379_v44 = vrot.slane %v366_v27, %v3065_v49 }
 0x3ec   :  { %v888_v1 = vsel %vm886_vm1, %v879_v33, %v881_v35 }
 0x3ed   :  { %v883_v38 = vpop.permute.xlu1 %882  ;;  %v893_v18 = vmul.f32 %v888_v1, %v310_v60 }
 0x3ee   :  { %v887_v61 = vsel %vm886_vm1, %v881_v35, %v883_v38  ;;  %v890_v62 = vsel %vm886_vm1, %v883_v38, %v877_v30 }
 0x3ef   :  { %v900_v46 = vpop.permute.xlu0 %899  ;;  %v891_v11 = vmul.f32 %v890_v62, %v302_v51  ;;  %v894_v12 = vmul.f32 %v887_v61, %v314_v52  ;;  %v383_v51 = vrot.slane %v366_v27, %v3058_v40  ;;  %v356_v52 = vrot.slane %v343_v26, %v3065_v49 }
 0x3f1   :  { %v902_v50 = vpop.permute.xlu1 %901 }
 0x3f2   :  { %v910_v53 = vsel %vm907_vm2, %v900_v46, %v902_v50 }
 0x3f3   :  { %v913_v56 = vmul.f32 %v910_v53, %v329_v47  ;;  %v904_v57 = vpop.permute.xlu0 %903 }
 0x3f4   :  { %v909_v63 = vsel %vm907_vm2, %v902_v50, %v904_v57  ;;  %v371_v50 = vrot.slane %v366_v27, %v3056_v39 }
 0x3f5   :  { %v906_v6 = vpop.permute.xlu1 %905  ;;  %v1946_v7 = vpack.c.bf16 %v913_v56, %v892_v55  ;;  %v914_v8 = vmul.f32 %v909_v63, %v333_v54 }
 0x3f6   :  { %v908_v9 = vsel %vm907_vm2, %v904_v57, %v906_v6  ;;  %v911_v10 = vsel %vm907_vm2, %v906_v6, %v900_v46 }
 0x3f7   :  { %v912_v13 = vmul.f32 %v911_v10, %v325_v58  ;;  %v915_v14 = vmul.f32 %v908_v9, %v337_v59  ;;  %1947 = vmatprep.subr.bf16.mxu0 %v1946_v7  ;;  %v921_v16 = vpop.permute.xlu0 %920  ;;  %v1964_v24 = vpack.c.bf16 %v914_v8, %v893_v18  ;;  %v389_v59 = vld [vmem:[#allocation6 + $0x4] ss:$8 sm:$0xf] }
 0x3f8   :  { %v394_v10 = vrot.slane %v389_v59, %v3056_v39 }
 0x3f9   :  { %v1948_v21 = vpack.c.bf16 %v912_v13, %v891_v11  ;;  %v923_v22 = vpop.permute.xlu1 %922  ;;  %v1962_v23 = vpack.c.bf16 %v915_v14, %v894_v12  ;;  %v398_v14 = vrot.slane %v389_v59, %v3053_v34 }
 0x3fa   :  { %v931_v33 = vsel %vm928_vm3, %v921_v16, %v923_v22 }
 0x3fb   :  { %1949 = vmatpush1.bf16.msra.mxu0 %v1948_v21  ;;  %1963 = vmatprep.subr.bf16.mxu1 %v1962_v23  ;;  %v925_v25 = vpop.permute.xlu0 %924  ;;  %v934_v46 = vmul.f32 %v931_v33, %v352_v29  ;;  %v406_v23 = vrot.slane %v389_v59, %v3058_v40 }
 0x3fc   :  { %1965 = vmatpush1.bf16.msra.mxu1 %v1964_v24  ;;  %v930_v56 = vsel %vm928_vm3, %v923_v22, %v925_v25  ;;  %v402_v22 = vrot.slane %v389_v59, %v3065_v49 }
 0x3fd   :  { %v927_v28 = vpop.permute.xlu1 %926  ;;  %v935_v9 = vmul.f32 %v930_v56, %v356_v52 }
 0x3fe   :  { %v929_v53 = vsel %vm928_vm3, %v925_v25, %v927_v28  ;;  %v932_v54 = vsel %vm928_vm3, %v927_v28, %v921_v16 }
 0x3ff   :  { %v942_v30 = vpop.permute.xlu0 %941  ;;  %v933_v63 = vmul.f32 %v932_v54, %v348_v36  ;;  %v936_v1 = vmul.f32 %v929_v53, %v360_v37 }
 0x401   :  { %v944_v35 = vpop.permute.xlu1 %943 }
 0x402   :  { %v952_v38 = vsel %vm949_vm4, %v942_v30, %v944_v35 }
 0x403   :  { %v955_v47 = vmul.f32 %v952_v38, %v375_v31  ;;  %v946_v48 = vpop.permute.xlu0 %945 }
 0x404   :  { %v951_v55 = vsel %vm949_vm4, %v944_v35, %v946_v48 }
 0x405   :  { %v948_v57 = vpop.permute.xlu1 %947  ;;  %v1950_v58 = vpack.c.bf16 %v955_v47, %v934_v46  ;;  %v956_v60 = vmul.f32 %v951_v55, %v379_v44 }
 0x406   :  { %v950_v61 = vsel %vm949_vm4, %v946_v48, %v948_v57  ;;  %v953_v62 = vsel %vm949_vm4, %v948_v57, %v942_v30  ;;  %v435_v48 = vld [vmem:[#allocation6 + $0x6] ss:$8 sm:$0xf] }
 0x407   :  { %v954_v6 = vmul.f32 %v953_v62, %v371_v50  ;;  %v957_v7 = vmul.f32 %v950_v61, %v383_v51  ;;  %1951 = vmatprep.subr.bf16.mxu0 %v1950_v58  ;;  %v967_v8 = vpop.permute.xlu0 %966  ;;  %v1968_v16 = vpack.c.bf16 %v956_v60, %v935_v9  ;;  %v412_v50 = vld [vmem:[#allocation6 + $0x5] ss:$8 sm:$0xf]  ;;  %v448_v60 = vrot.slane %v435_v48, %v3065_v49 }
 0x408   :  { %v425_v54 = vrot.slane %v412_v50, %v3065_v49  ;;  %v429_v55 = vrot.slane %v412_v50, %v3058_v40  ;;  %v452_v61 = vrot.slane %v435_v48, %v3058_v40 }
 0x409   :  { %v1952_v11 = vpack.c.bf16 %v954_v6, %v933_v63  ;;  %v969_v12 = vpop.permute.xlu1 %968  ;;  %v1966_v13 = vpack.c.bf16 %v957_v7, %v936_v1 }
 0x40a   :  { %v977_v18 = vsel %vm974_vm5, %v967_v8, %v969_v12 }
 0x40b   :  { %1953 = vmatpush1.bf16.msra.mxu0 %v1952_v11  ;;  %1967 = vmatprep.subr.bf16.mxu1 %v1966_v13  ;;  %v971_v21 = vpop.permute.xlu0 %970  ;;  %v979_v24 = vmul.f32 %v977_v18, %v394_v10 }
 0x40c   :  { %v976_v25 = vsel %vm974_vm5, %v969_v12, %v971_v21  ;;  %1969 = vmatpush1.bf16.msra.mxu1 %v1968_v16 }
 0x40d   :  { %v980_v26 = vmul.f32 %v976_v25, %v398_v14  ;;  %v973_v27 = vpop.permute.xlu1 %972  ;;  %v1956_v36 = vpack.c.bf16 %v979_v24, %v3011_v15  ;;  %v440_v15 = vrot.slane %v435_v48, %v3056_v39 }
 0x40e   :  { %v975_v28 = vsel %vm974_vm5, %v971_v21, %v973_v27  ;;  %v978_v29 = vsel %vm974_vm5, %v973_v27, %v967_v8  ;;  %v458_v21 = vld [vmem:[#allocation6 + $0x7] ss:$8 sm:$0xf] }
 0x40f   :  { %v981_v30 = vmul.f32 %v975_v28, %v402_v22  ;;  %v982_v31 = vmul.f32 %v978_v29, %v406_v23  ;;  %v988_v33 = vpop.permute.xlu0 %987  ;;  %v1954_v35 = vpack.c.bf16 %v980_v26, %v3013_v17  ;;  %v417_v17 = vrot.slane %v412_v50, %v3056_v39 }
 0x410   :  { %v467_v27 = vrot.slane %v458_v21, %v3053_v34  ;;  %v463_v28 = vrot.slane %v458_v21, %v3056_v39 }
 0x411   :  { %v1972_v37 = vpack.c.bf16 %v981_v30, %v3016_v19  ;;  %v990_v38 = vpop.permute.xlu1 %989  ;;  %1955 = vmatprep.subr.bf16.mxu0 %v1954_v35  ;;  %v1970_v44 = vpack.c.bf16 %v982_v31, %v3019_v20  ;;  %v421_v19 = vrot.slane %v412_v50, %v3053_v34  ;;  %v444_v20 = vrot.slane %v435_v48, %v3053_v34 }
 0x412   :  { %1957 = vmatpush1.bf16.msra.mxu0 %v1956_v36  ;;  %v998_v57 = vsel %vm995_vm7, %v988_v33, %v990_v38  ;;  %v471_v31 = vrot.slane %v458_v21, %v3065_v49 }
 0x413   :  { %1971 = vmatprep.subr.bf16.mxu1 %v1970_v44  ;;  %v992_v46 = vpop.permute.xlu0 %991  ;;  %v1000_v9 = vmul.f32 %v998_v57, %v417_v17  ;;  %v873_v44 = vld [vmem:[#allocation17] sm:$0xff] }
 0x414   :  { %1973 = vmatpush1.bf16.msra.mxu1 %v1972_v37  ;;  %v997_v53 = vsel %vm995_vm7, %v990_v38, %v992_v46 }
 0x415   :  { %v994_v47 = vpop.permute.xlu1 %993  ;;  %v1001_v6 = vmul.f32 %v997_v53, %v421_v19 }
 0x416   :  { %v996_v58 = vsel %vm995_vm7, %v992_v46, %v994_v47  ;;  %v999_v62 = vsel %vm995_vm7, %v994_v47, %v988_v33  ;;  %v475_v33 = vrot.slane %v458_v21, %v3058_v40 }
 0x417   :  { %v1009_v51 = vpop.permute.xlu0 %1008  ;;  %v1002_v10 = vmul.f32 %v996_v58, %v425_v54  ;;  %v1003_v13 = vmul.f32 %v999_v62, %v429_v55 }
 0x419   :  { %v1011_v52 = vpop.permute.xlu1 %1010 }
 0x41a   :  { %v1019_v56 = vsel %vm1016_vm6, %v1009_v51, %v1011_v52 }
 0x41b   :  { %v1013_v59 = vpop.permute.xlu0 %1012  ;;  %v1021_v63 = vmul.f32 %v1019_v56, %v440_v15 }
 0x41c   :  { %v1018_v1 = vsel %vm1016_vm6, %v1011_v52, %v1013_v59 }
 0x41d   :  { %v1022_v7 = vmul.f32 %v1018_v1, %v444_v20  ;;  %v1015_v8 = vpop.permute.xlu1 %1014  ;;  %v1960_v23 = vpack.c.bf16 %v1021_v63, %v1000_v9 }
 0x41e   :  { %v1017_v11 = vsel %vm1016_vm6, %v1013_v59, %v1015_v8  ;;  %v1020_v12 = vsel %vm1016_vm6, %v1015_v8, %v1009_v51 }
 0x41f   :  { %v1023_v14 = vmul.f32 %v1017_v11, %v448_v60  ;;  %v1024_v16 = vmul.f32 %v1020_v12, %v452_v61  ;;  %v1030_v18 = vpop.permute.xlu0 %1029  ;;  %v1958_v22 = vpack.c.bf16 %v1022_v7, %v1001_v6 }
 0x421   :  { %v1976_v24 = vpack.c.bf16 %v1023_v14, %v1002_v10  ;;  %v1032_v25 = vpop.permute.xlu1 %1031  ;;  %1959 = vmatprep.subr.bf16.mxu0 %v1958_v22  ;;  %v1974_v26 = vpack.c.bf16 %v1024_v16, %v1003_v13 }
 0x422   :  { %1961 = vmatpush1.bf16.msra.mxu0 %v1960_v23  ;;  %v1040_v29 = vsel %vm1037_vm8, %v1030_v18, %v1032_v25  ;;  %v1282_v23 = vld [vmem:[#allocation21] sm:$0xff] }
 0x423   :  { %1975 = vmatprep.subr.bf16.mxu1 %v1974_v26  ;;  %v1034_v30 = vpop.permute.xlu0 %1033  ;;  %v1042_v38 = vmul.f32 %v1040_v29, %v463_v28  ;;  %v1428_v26 = vld [vmem:[#allocation23] sm:$0xff] }
 0x424   :  { %v1039_v35 = vsel %vm1037_vm8, %v1032_v25, %v1034_v30  ;;  %1977 = vmatpush1.bf16.msra.mxu1 %v1976_v24 }
 0x425   :  { %v1043_v36 = vmul.f32 %v1039_v35, %v467_v27  ;;  %v1036_v37 = vpop.permute.xlu1 %1035 }
 0x426   :  { %v1038_v34 = vsel %vm1037_vm8, %v1034_v30, %v1036_v37  ;;  %v1041_v39 = vsel %vm1037_vm8, %v1036_v37, %v1030_v18 }
 0x427   :  { %v1044_v46 = vmul.f32 %v1038_v34, %v471_v31  ;;  %v1045_v47 = vmul.f32 %v1041_v39, %v475_v33  ;;  %1106 = vmatprep.subr.mxu0 %v1043_v36 }
 0x428   :  { %1107 = vmatpush1.msra.mxu0 %v1042_v38 }
 0x429   :  { %1177 = vmatprep.subr.mxu1 %v1045_v47  ;;  %1922 = vmatmul.mubr.msk.f32.vlgmr.msra.gmra.mrb[4].mxu0 %vm1086_vm9, %v873_v44 }
 0x42a   :  { %1178 = vmatpush1.msra.mxu1 %v1044_v46  ;;  %1350 = vmatprep.mubr.f32.mxu0 %v2621_v0 }
 0x42b   :  { %1923 = vmatmul.mubr.msk.f32.vlgmr.msra.gmra.mrb[4].mxu1 %vm1086_vm9, %v873_v44 }
 0x42c   :  { %1421 = vmatprep.mubr.f32.mxu1 %v2621_v0 }
 0x434   :  { %v1235_v40 = vpop.permute.xlu0 %1234 }
 0x436   :  { %v1244_v32 = vpop.permute.xlu1 %1243 }
 0x4fc   :  { %v1156_v49 = vpop.f32.mrb[4].mxu0 }
 0x4fd   :  { %v1237_v48 = vmul.f32 %v1235_v40, %v1156_v49  ;;  %v1158_v50 = vpop.f32.mrb[5].mxu0 }
 0x4fe   :  { %v1238_v51 = vmul.f32 %v1235_v40, %v1158_v50  ;;  %v1227_v15 = vpop.f32.mrb[4].mxu1 }
 0x4ff   :  { %v1246_v17 = vadd.f32 %v1244_v32, %v1237_v48  ;;  %v1239_v19 = vmul.f32 %v1235_v40, %v1227_v15  ;;  %v1229_v52 = vpop.f32.mrb[5].mxu1 }
 0x500   :  { %v1247_v20 = vadd.f32 %v1244_v32, %v1238_v51  ;;  %v1240_v53 = vmul.f32 %v1235_v40, %v1229_v52 }
 0x501   :  { %v1924_v54 = vmul.f32 -1.442695, %v1246_v17  ;;  %v1248_v55 = vadd.f32 %v1244_v32, %v1239_v19 }
 0x502   :  { %v1925_v56 = vmul.f32 -1.442695, %v1247_v20  ;;  %v1249_v57 = vadd.f32 %v1244_v32, %v1240_v53 }
 0x503   :  { %2051 = vpow2.f32 %v1924_v54  ;;  %v1926_v58 = vmul.f32 -1.442695, %v1248_v55 }
 0x504   :  { %2053 = vpow2.f32 %v1925_v56  ;;  %v1927_v59 = vmul.f32 -1.442695, %v1249_v57 }
 0x505   :  { %2055 = vpow2.f32 %v1926_v58 }
 0x506   :  { %2057 = vpow2.f32 %v1927_v59 }
 0x50d   :  { %v2052_v60 = vpop.eup %2051 }
 0x50e   :  { %v2054_v61 = vpop.eup %2053  ;;  %v1262_v62 = vadd.f32 1.0, %v2052_v60 }
 0x50f   :  { %v2056_v63 = vpop.eup %2055  ;;  %v1263_v1 = vadd.f32 1.0, %v2054_v61 }
 0x510   :  { %v2058_v6 = vpop.eup %2057  ;;  %2059 = vrcp.f32 %v1262_v62  ;;  %v1264_v7 = vadd.f32 1.0, %v2056_v63 }
 0x511   :  { %2061 = vrcp.f32 %v1263_v1  ;;  %v1265_v8 = vadd.f32 1.0, %v2058_v6 }
 0x512   :  { %2063 = vrcp.f32 %v1264_v7 }
 0x513   :  { %2065 = vrcp.f32 %v1265_v8 }
 0x51a   :  { %v2060_v9 = vpop.eup %2059 }
 0x51b   :  { %v2062_v10 = vpop.eup %2061  ;;  %v1274_v11 = vmul.f32 %v2060_v9, %v1246_v17 }
 0x51c   :  { %v2064_v12 = vpop.eup %2063  ;;  %v1275_v13 = vmul.f32 %v2062_v10, %v1247_v20 }
 0x51d   :  { %v2066_v14 = vpop.eup %2065  ;;  %v1276_v16 = vmul.f32 %v2064_v12, %v1248_v55  ;;  %v1278_v22 = vadd.f32 %v1274_v11, %v2997_v42 }
 0x51e   :  { %v1277_v18 = vmul.f32 %v2066_v14, %v1249_v57  ;;  %v1279_v21 = vadd.f32 %v1275_v13, %v2995_v41  ;;  %v1626_v41 = vpop.permute.xlu1 %1625 }
 0x51f   :  { %v1280_v25 = vadd.f32 %v1276_v16, %v3001_v45 }
 0x520   :  { %1286 = vmatprep.subr.mxu0 %v1279_v21  ;;  %v1281_v24 = vadd.f32 %v1277_v18, %v2999_v43 }
 0x521   :  { %1287 = vmatpush1.msra.mxu0 %v1278_v22 }
 0x522   :  { %1357 = vmatprep.subr.mxu1 %v1281_v24  ;;  %1928 = vmatmul.mubr.msk.f32.vlgmr.msra.gmra.mrb[6].mxu0 %vm485_vm0, %v1282_v23  ;;  %v1636_v38 = vpop.permute.xlu1 %1635 }
 0x523   :  { %1358 = vmatpush1.msra.mxu1 %v1280_v25  ;;  %1432 = vmatprep.subr.mxu0 %v2979_v2  ;;  %v1578_v2 = vpop.permute.xlu0 %1577 }
 0x524   :  { %1929 = vmatmul.mubr.msk.f32.vlgmr.msra.gmra.mrb[6].mxu1 %vm485_vm0, %v1282_v23  ;;  %1433 = vmatpush1.msra.mxu0 %v2983_v4 }
 0x525   :  { %1496 = vmatprep.mubr.f32.mxu0 %v2621_v0  ;;  %1503 = vmatprep.subr.mxu1 %v2981_v3 }
 0x526   :  { %1930 = vmatmul.mubr.msk.f32.vlgmr.msra.gmra.mrb[8].mxu0 %vm485_vm0, %v1428_v26  ;;  %1504 = vmatpush1.msra.mxu1 %v2987_v5 }
 0x527   :  { %1567 = vmatprep.mubr.f32.mxu1 %v2621_v0  ;;  %1755 = vmatprep.mubr.f32.mxu0 %v2621_v0  ;;  %v1588_v45 = vpop.permute.xlu0 %1587 }
 0x528   :  { %1931 = vmatmul.mubr.msk.f32.vlgmr.msra.gmra.mrb[8].mxu1 %vm485_vm0, %v1428_v26 }
 0x529   :  { %1826 = vmatprep.mubr.f32.mxu1 %v2621_v0 }
 0x5f5   :  { %v1352_v42 = vpop.f32.mrb[6].mxu0 }
 0x5f6   :  { %v1580_v4 = vmul.f32 %v1578_v2, %v1352_v42  ;;  %v1354_v43 = vpop.f32.mrb[7].mxu0 }
 0x5f7   :  { %v1581_v27 = vmul.f32 %v1578_v2, %v1354_v43  ;;  %v1423_v3 = vpop.f32.mrb[6].mxu1 }
 0x5f8   :  { %v3179_v28 = vadd.f32 %v1588_v45, %v1580_v4  ;;  %v1582_v29 = vmul.f32 %v1578_v2, %v1423_v3  ;;  %v1425_v5 = vpop.f32.mrb[7].mxu1 }
 0x5f9   :  { %v3181_v30 = vadd.f32 %v1588_v45, %v1581_v27  ;;  %v1583_v31 = vmul.f32 %v1578_v2, %v1425_v5  ;;  %v1498_v33 = vpop.f32.mrb[8].mxu0 }
 0x5fa   :  { %v1932_v35 = vmul.f32 -1.442695, %v3179_v28  ;;  %v3184_v36 = vadd.f32 %v1588_v45, %v1582_v29  ;;  %v1628_v0 = vmul.f32 %v1626_v41, %v1498_v33  ;;  %v1500_v37 = vpop.f32.mrb[9].mxu0  ;;  %v1678_v29 = vld [vmem:[#allocation30] sm:$0xff]  ;;  %v1847_v33 = vpop.permute.xlu1 %1846 }
 0x5fb   :  { %v1933_v34 = vmul.f32 -1.442695, %v3181_v30  ;;  %v3187_v39 = vadd.f32 %v1588_v45, %v1583_v31  ;;  %v1629_v44 = vmul.f32 %v1626_v41, %v1500_v37  ;;  %v1569_v46 = vpop.f32.mrb[8].mxu1 }
 0x5fc   :  { %2067 = vpow2.f32 %v1932_v35  ;;  %v1934_v47 = vmul.f32 -1.442695, %v3184_v36  ;;  %v1638_v40 = vadd.f32 %v1636_v38, %v1628_v0  ;;  %v1630_v49 = vmul.f32 %v1626_v41, %v1569_v46  ;;  %v1571_v48 = vpop.f32.mrb[9].mxu1 }
 0x5fd   :  { %2069 = vpow2.f32 %v1933_v34  ;;  %v1935_v50 = vmul.f32 -1.442695, %v3187_v39  ;;  %v1639_v32 = vadd.f32 %v1636_v38, %v1629_v44  ;;  %v1631_v51 = vmul.f32 %v1626_v41, %v1571_v48 }
 0x5fe   :  { %2071 = vpow2.f32 %v1934_v47  ;;  %v1936_v15 = vmul.f32 -1.442695, %v1638_v40  ;;  %v1640_v17 = vadd.f32 %v1636_v38, %v1630_v49 }
 0x5ff   :  { %2073 = vpow2.f32 %v1935_v50  ;;  %v1937_v19 = vmul.f32 -1.442695, %v1639_v32  ;;  %v1641_v52 = vadd.f32 %v1636_v38, %v1631_v51 }
 0x600   :  { %2075 = vpow2.f32 %v1936_v15  ;;  %v1938_v20 = vmul.f32 -1.442695, %v1640_v17 }
 0x601   :  { %2077 = vpow2.f32 %v1937_v19  ;;  %v1939_v53 = vmul.f32 -1.442695, %v1641_v52 }
 0x602   :  { %2079 = vpow2.f32 %v1938_v20 }
 0x603   :  { %2081 = vpow2.f32 %v1939_v53 }
 0x606   :  { %v2068_v54 = vpop.eup %2067 }
 0x607   :  { %v2070_v55 = vpop.eup %2069  ;;  %v1606_v56 = vadd.f32 1.0, %v2068_v54 }
 0x608   :  { %v2072_v57 = vpop.eup %2071  ;;  %v1607_v58 = vadd.f32 1.0, %v2070_v55 }
 0x609   :  { %v2074_v59 = vpop.eup %2073  ;;  %2083 = vrcp.f32 %v1606_v56  ;;  %v1608_v60 = vadd.f32 1.0, %v2072_v57 }
 0x60a   :  { %v2076_v61 = vpop.eup %2075  ;;  %2085 = vrcp.f32 %v1607_v58  ;;  %v1609_v62 = vadd.f32 1.0, %v2074_v59 }
 0x60b   :  { %v2078_v63 = vpop.eup %2077  ;;  %2087 = vrcp.f32 %v1608_v60  ;;  %v1654_v1 = vadd.f32 1.0, %v2076_v61 }
 0x60c   :  { %v2080_v6 = vpop.eup %2079  ;;  %2089 = vrcp.f32 %v1609_v62  ;;  %v1655_v7 = vadd.f32 1.0, %v2078_v63 }
 0x60d   :  { %v2082_v8 = vpop.eup %2081  ;;  %2091 = vrcp.f32 %v1654_v1  ;;  %v1656_v9 = vadd.f32 1.0, %v2080_v6 }
 0x60e   :  { %2093 = vrcp.f32 %v1655_v7  ;;  %v1657_v10 = vadd.f32 1.0, %v2082_v8 }
 0x60f   :  { %2095 = vrcp.f32 %v1656_v9 }
 0x610   :  { %2097 = vrcp.f32 %v1657_v10 }
 0x613   :  { %v2084_v11 = vpop.eup %2083 }
 0x614   :  { %v2086_v12 = vpop.eup %2085  ;;  %v1618_v21 = vmul.f32 %v2084_v11, %v3179_v28  ;;  %v1837_v28 = vpop.permute.xlu0 %1836 }
 0x615   :  { %v2088_v13 = vpop.eup %2087  ;;  %v1619_v24 = vmul.f32 %v2086_v12, %v3181_v30 }
 0x616   :  { %v2090_v14 = vpop.eup %2089  ;;  %v1620_v2 = vmul.f32 %v2088_v13, %v3184_v36 }
 0x617   :  { %v2092_v16 = vpop.eup %2091  ;;  %v1621_v4 = vmul.f32 %v2090_v14, %v3187_v39 }
 0x618   :  { %v2094_v18 = vpop.eup %2093  ;;  %v1666_v22 = vmul.f32 %v2092_v16, %v1638_v40 }
 0x619   :  { %v2096_v23 = vpop.eup %2095  ;;  %v1667_v25 = vmul.f32 %v2094_v18, %v1639_v32 }
 0x61a   :  { %v2098_v26 = vpop.eup %2097  ;;  %v1980_v41 = vpack.c.bf16 %v1666_v22, %v1618_v21  ;;  %v1668_v42 = vmul.f32 %v2096_v23, %v1640_v17 }
 0x61b   :  { %v1669_v43 = vmul.f32 %v2098_v26, %v1641_v52  ;;  %v1978_v45 = vpack.c.bf16 %v1667_v25, %v1619_v24 }
 0x61c   :  { %v1984_v27 = vpack.c.bf16 %v1668_v42, %v1620_v2 }
 0x61d   :  { %1979 = vmatprep.subr.bf16.mxu0 %v1978_v45  ;;  %v1982_v3 = vpack.c.bf16 %v1669_v43, %v1621_v4 }
 0x61e   :  { %1981 = vmatpush1.bf16.msra.mxu0 %v1980_v41 }
 0x61f   :  { %1983 = vmatprep.subr.bf16.mxu1 %v1982_v3 }
 0x620   :  { %1985 = vmatpush1.bf16.msra.mxu1 %v1984_v27 }
 0x621   :  { %1940 = vmatmul.mubr.msk.f32.vlgmr.msra.gmra.mrb[10].mxu0 %vm1687_vm10, %v1678_v29 }
 0x623   :  { %1941 = vmatmul.mubr.msk.f32.vlgmr.msra.gmra.mrb[10].mxu1 %vm1687_vm10, %v1678_v29 }
 0x6f4   :  { %v1757_v5 = vpop.f32.mrb[10].mxu0 }
 0x6f5   :  { %v1839_v30 = vmul.f32 %v1837_v28, %v1757_v5  ;;  %v1759_v31 = vpop.f32.mrb[11].mxu0 }
 0x6f6   :  { %v1840_v35 = vmul.f32 %v1837_v28, %v1759_v31  ;;  %v1828_v36 = vpop.f32.mrb[10].mxu1 }
 0x6f7   :  { %v1849_v0 = vadd.f32 %v1847_v33, %v1839_v30  ;;  %v1841_v37 = vmul.f32 %v1837_v28, %v1828_v36  ;;  %v1830_v38 = vpop.f32.mrb[11].mxu1 }
 0x6f8   :  { %v1850_v34 = vadd.f32 %v1847_v33, %v1840_v35  ;;  %v1842_v39 = vmul.f32 %v1837_v28, %v1830_v38 }
 0x6f9   :  { %v1942_v44 = vmul.f32 -1.442695, %v1849_v0  ;;  %v1851_v46 = vadd.f32 %v1847_v33, %v1841_v37 }
 0x6fa   :  { %v1943_v47 = vmul.f32 -1.442695, %v1850_v34  ;;  %v1852_v40 = vadd.f32 %v1847_v33, %v1842_v39 }
 0x6fb   :  { %2099 = vpow2.f32 %v1942_v44  ;;  %v1944_v49 = vmul.f32 -1.442695, %v1851_v46 }
 0x6fc   :  { %2101 = vpow2.f32 %v1943_v47  ;;  %v1945_v48 = vmul.f32 -1.442695, %v1852_v40 }
 0x6fd   :  { %2103 = vpow2.f32 %v1944_v49 }
 0x6fe   :  { %2105 = vpow2.f32 %v1945_v48 }
 0x705   :  { %v2100_v50 = vpop.eup %2099 }
 0x706   :  { %v2102_v32 = vpop.eup %2101  ;;  %v1865_v51 = vadd.f32 1.0, %v2100_v50 }
 0x707   :  { %v2104_v15 = vpop.eup %2103  ;;  %v1866_v17 = vadd.f32 1.0, %v2102_v32 }
 0x708   :  { %v2106_v19 = vpop.eup %2105  ;;  %2107 = vrcp.f32 %v1865_v51  ;;  %v1867_v52 = vadd.f32 1.0, %v2104_v15 }
 0x709   :  { %2109 = vrcp.f32 %v1866_v17  ;;  %v1868_v20 = vadd.f32 1.0, %v2106_v19 }
 0x70a   :  { %2111 = vrcp.f32 %v1867_v52 }
 0x70b   :  { %2113 = vrcp.f32 %v1868_v20 }
 0x712   :  { %v2108_v53 = vpop.eup %2107 }
 0x713   :  { %v2110_v54 = vpop.eup %2109  ;;  %v1877_v55 = vmul.f32 %v2108_v53, %v1849_v0 }
 0x714   :  { %v2112_v56 = vpop.eup %2111  ;;  %v1878_v57 = vmul.f32 %v2110_v54, %v1850_v34 }
 0x715   :  { %v2114_v58 = vpop.eup %2113  ;;  %1881 = vst [vmem:[#allocation35] sm:$0xff] %v1877_v55  ;;  %v1879_v59 = vmul.f32 %v2112_v56, %v1851_v46 }
 0x716   :  { %1882 = vst [vmem:[#allocation35 + $0x8] sm:$0xff] %v1878_v57  ;;  %v1880_v60 = vmul.f32 %v2114_v58, %v1852_v40 }
 0x717   :  { %1883 = vst [vmem:[#allocation35 + $0x10] sm:$0xff] %v1879_v59 }
 0x718   :  { %1884 = vst [vmem:[#allocation35 + $0x18] sm:$0xff] %v1880_v60 }
 0x719   :  { %2566 = shalt.err (!%p2563_p10)
}
 0x71a   :  { %s2567_s5 = scalar_lea.hbm %s3227_s20, 512 }
 0x71b   :  { %p2568_p11 = scmp.ne.s32.totalorder %s3227_s20, %s2567_s5  ;;  %p2571_p12 = scmp.lt.u32.totalorder %s2567_s5, %s3227_s20 }
 0x71d   :  { %p2573_p13 = pnand %p2571_p12, %p2568_p11 }
 0x71f   :  { %2576 = shalt.err (!%p2573_p13)
}
 0x720   :  { %1894 = dma.vmem_to_hbm [thread:$0]  %s1892_s22, 512, %s3227_s20, [#allocation5]  }
 0x721   :  { %2599 = dma.done.wait [#allocation5], 512  }
 0x722   :  { %2600 = vsyncadd [#allocation5], 4294966784 }
 0x723   :  { %1898 = vsyncpa [#allocation4], 1 }
 0x724   :  { %1899 = vsyncpa [#allocation7], 1 }
 0x725   :  { %1900 = vsyncpa [#allocation10], 1 }
 0x726   :  { %1901 = vsyncpa [#allocation13], 1 }
 0x727   :  { %1902 = vsyncpa [#allocation16], 1 }
 0x728   :  { %1903 = vsyncpa [#allocation19], 1 }
 0x729   :  { %1904 = vsyncpa [#allocation22], 1 }
 0x72a   :  { %1905 = vsyncpa [#allocation25], 1 }
 0x72b   :  { %1906 = vsyncpa [#allocation28], 1 }
 0x72c   :  { %1907 = vsyncpa [#allocation31], 1 }
 0x72d   :  { %1908 = vsyncpa [#allocation34], 1 }
 0x72e   :  { %1909 = vsyncpa [#allocation5], 1 }

</bundles_post_ra>
